<compile_context>
chip_gen: v6e
topology: v6e:2x2x1
jax: 0.10.0
libtpu: 0.0.40
codegen_flags: <defaults>
</compile_context>

<pallas_src>
import math
import jax
import jax.numpy as jnp
from jax.experimental import pallas as pl
from jax.experimental.pallas import tpu as pltpu


def _round_up(x, m):
    return ((x + m - 1) // m) * m


# --------------------------------------------------------------------------
# DDPM schedules (registered buffers in the PyTorch module) — plain JAX glue.
# --------------------------------------------------------------------------
def ddpm_schedules(beta1, beta2, T):
    """Pre-computed schedules for DDPM sampling / training."""
    assert beta1 < beta2 < 1.0, "beta1 and beta2 must be in (0, 1)"
    beta_t = jnp.linspace(beta1, beta2, T, dtype=jnp.float32)
    sqrt_beta_t = jnp.sqrt(beta_t)
    alpha_t = 1.0 - beta_t
    log_alpha_t = jnp.log(alpha_t)
    alphabar_t = jnp.exp(jnp.cumsum(log_alpha_t))
    sqrtab = jnp.sqrt(alphabar_t)
    oneover_sqrta = 1.0 / jnp.sqrt(alpha_t)
    sqrtmab = jnp.sqrt(1.0 - alphabar_t)
    mab_over_sqrtmab_inv = (1.0 - alpha_t) / sqrtmab
    return {
        "beta_t": beta_t,
        "alpha_t": alpha_t,
        "oneover_sqrta": oneover_sqrta,
        "sqrt_beta_t": sqrt_beta_t,
        "alphabar_t": alphabar_t,
        "sqrtab": sqrtab,
        "sqrtmab": sqrtmab,
        "mab_over_sqrtmab": mab_over_sqrtmab_inv,
    }


# --------------------------------------------------------------------------
# Pallas kernel: fused conditional denoiser
#   h   = relu(x_aug @ W_aug)      x_aug = [x, t_norm, c, 1],  W_aug = [W1;Wt;Wc;b1]
#   out = h @ W2 + b2
# Weights are full-array VMEM blocks (resident, single-buffered); x/out are
# tiled over the batch axis and pipelined.
# --------------------------------------------------------------------------
def denoiser_kernel(x_ref, w1_ref, w2_ref, b2_ref, o_ref):
    # bf16 x bf16 -> f32 accumulation on the MXU
    h = jnp.dot(x_ref[...], w1_ref[...], preferred_element_type=jnp.float32)
    h = jnp.maximum(h, 0.0)
    out = jnp.dot(h.astype(jnp.bfloat16), w2_ref[...],
                  preferred_element_type=jnp.float32)
    o_ref[...] = (out + b2_ref[...]).astype(o_ref.dtype)


def _denoiser_pallas(x_aug, params, feat, tile_n, out_dtype):
    n_pad, k_pad = x_aug.shape
    hidden = params["W_aug"].shape[1]
    grid_n = n_pad // tile_n

    out_itemsize = jnp.dtype(out_dtype).itemsize
    flops = 2 * n_pad * (k_pad * hidden + hidden * feat)
    bytes_accessed = (x_aug.size * 2                   # bf16 activations in
                      + params["W_aug"].size * 2       # bf16 weights
                      + params["W2"].size * 2
                      + params["b2"].size * 4
                      + n_pad * feat * out_itemsize)   # output writeback

    # Only split across v7x's two TensorCores when each core gets big tiles;
    # otherwise the duplicated resident-weight DMA outweighs the parallelism.
    semantics = ("parallel",) if (grid_n >= 2 and tile_n >= 256) else ("arbitrary",)

    return pl.pallas_call(
        denoiser_kernel,
        out_shape=jax.ShapeDtypeStruct((n_pad, feat), out_dtype),
        grid=(grid_n,),
        in_specs=[
            # x: streamed over the batch axis (double-buffered by default)
            pl.BlockSpec((tile_n, k_pad), lambda i: (i, 0)),
            # weights/bias: constant index_map -> resident; single-buffer them
            pl.BlockSpec((k_pad, hidden), lambda i: (0, 0),
                         pipeline_mode=pl.Buffered(1)),
            pl.BlockSpec((hidden, feat), lambda i: (0, 0),
                         pipeline_mode=pl.Buffered(1)),
            pl.BlockSpec((1, feat), lambda i: (0, 0),
                         pipeline_mode=pl.Buffered(1)),
        ],
        out_specs=pl.BlockSpec((tile_n, feat), lambda i: (i, 0)),
        compiler_params=pltpu.CompilerParams(dimension_semantics=semantics),
        cost_estimate=pl.CostEstimate(
            flops=flops, transcendentals=0, bytes_accessed=bytes_accessed),
    )(x_aug, params["W_aug"], params["W2"], params["b2"])


def nn_model_forward(params, x_t, _ts, c, n_T, max_tile_n=512):
    """Synthetic nn_model(x_t, _ts, c) with the hot path in Pallas."""
    N, C, H, W = x_t.shape
    feat = C * H * W
    classes_n = c.shape[1]
    k = feat + 1 + classes_n + 1
    k_pad = params["K_pad"]

    # One large batch tile (multiple of 16 for bf16 sublane packing, capped at
    # max_tile_n rows ~= 2.2 MiB of streamed VMEM) -> grid=(1,) for N<=512.
    tile_n = min(_round_up(N, 16), max_tile_n)
    n_pad = _round_up(N, tile_n)

    # Build x_aug = [x, t/n_T, c, 1, 0-pad] directly in bf16 with one concat so
    # time/class conditioning and b1 fold into a single MXU matmul in-kernel.
    x_flat = x_t.reshape(N, feat).astype(jnp.bfloat16)
    t_norm = (_ts.astype(jnp.float32) / float(n_T)).reshape(N, 1).astype(jnp.bfloat16)
    c_bf = c.astype(jnp.bfloat16)
    ones = jnp.ones((N, 1), jnp.bfloat16)
    pad_cols = jnp.zeros((N, k_pad - k), jnp.bfloat16)
    x_aug = jnp.concatenate([x_flat, t_norm, c_bf, ones, pad_cols], axis=1)
    if n_pad != N:
        x_aug = jnp.pad(x_aug, ((0, n_pad - N), (0, 0)))

    out = _denoiser_pallas(x_aug, params, feat, tile_n, x_t.dtype)
    return out[:N].reshape(N, C, H, W)


# --------------------------------------------------------------------------
# DPM wrapper (mirrors the PyTorch module's buffers + forward)
# --------------------------------------------------------------------------
class DPM:
    def __init__(self, nn_params, betas, n_T, classes_n, drop_prob=0.1, n_once=1):
        self.nn_params = nn_params
        self.n_T = n_T
        self.drop_prob = drop_prob
        for k, v in ddpm_schedules(betas[0], betas[1], n_T).items():
            setattr(self, k, v)  # registered buffers
        # condition / uncondition buffers: one_hot(arange(classes_n)).repeat(n_once, 1)
        self.condition = jnp.tile(jnp.eye(classes_n, dtype=jnp.float32), (n_once, 1))
        self.uncondition = jnp.zeros((classes_n * n_once, classes_n), jnp.float32)
        # TODO(synk): NoiseScheduleVP / model_wrapper / DPM_Solver are external
        # sampler utilities not used by forward(); not translated.

    def forward(self, x_t, _ts, c):
        return nn_model_forward(self.nn_params, x_t, _ts, c, self.n_T)


def init_params(key, feat, hidden, classes_n):
    k1, k2, k3, k4 = jax.random.split(key, 4)
    s = lambda fan_in: 1.0 / math.sqrt(fan_in)
    W1 = jax.random.normal(k1, (feat, hidden), jnp.float32) * s(feat)
    Wt = jax.random.normal(k2, (1, hidden), jnp.float32)
    Wc = jax.random.normal(k3, (classes_n, hidden), jnp.float32) * s(classes_n)
    b1 = jnp.zeros((1, hidden), jnp.float32)
    W2 = jax.random.normal(k4, (hidden, feat), jnp.float32) * s(hidden)
    b2 = jnp.zeros((1, feat), jnp.float32)

    # Fuse [W1; Wt; Wc; b1] along K (matches x_aug = [x, t_norm, c, 1]);
    # pad K to a multiple of 128 so the x lane dimension stays dense.
    k = feat + 1 + classes_n + 1
    k_pad = _round_up(k, 128)
    W_aug = jnp.concatenate([W1, Wt, Wc, b1], axis=0)
    W_aug = jnp.pad(W_aug, ((0, k_pad - k), (0, 0)))

    return {
        "W_aug": W_aug.astype(jnp.bfloat16),
        "W2": W2.astype(jnp.bfloat16),
        "b2": b2,                      # f32 bias added after f32 accumulation
        "K_pad": k_pad,
    }


if __name__ == "__main__":
    classes_n = 8
    n_once = 16
    N = classes_n * n_once          # 128 samples -> single 128-row tile, grid=(1,)
    C, H, W = 4, 16, 16
    hidden = 256                    # lane-dense, fills the 256-wide MXU on v6e/v7x
    n_T = 400
    betas = (1e-4, 0.02)

    key = jax.random.PRNGKey(0)
    kp, kx, kt = jax.random.split(key, 3)

    params = init_params(kp, C * H * W, hidden, classes_n)
    dpm = DPM(params, betas, n_T, classes_n, drop_prob=0.1, n_once=n_once)

    # bf16 activations (f32 MXU accumulation inside the kernel); the kernel
    # emits x_t.dtype so output HBM writeback is bf16-sized as well.
    x_t = jax.random.normal(kx, (N, C, H, W), jnp.float32).astype(jnp.bfloat16)
    _ts = jax.random.randint(kt, (N,), 0, n_T)
    c = dpm.condition               # (N, classes_n) one-hot conditioning buffer

    out = dpm.forward(x_t, _ts, c)
    out = jax.block_until_ready(out)
    assert out.shape == x_t.shape and out.dtype == x_t.dtype
    assert bool(jnp.all(jnp.isfinite(out.astype(jnp.float32))))
    print("KERNEL_OK")
</pallas_src>

<mosaic_0001>
module attributes {stable_mosaic.version = 11 : i64} {
  func.func @denoiser_kernel(%arg0: i32, %arg1: memref<128x1152xbf16, #tpu.memory_space<vmem>>, %arg2: memref<1152x256xbf16, #tpu.memory_space<vmem>>, %arg3: memref<256x1024xbf16, #tpu.memory_space<vmem>>, %arg4: memref<1x1024xf32, #tpu.memory_space<vmem>>, %arg5: memref<128x1024xbf16, #tpu.memory_space<vmem>>) attributes {dimension_semantics = [#tpu.dimension_semantics<arbitrary>], iteration_bounds = array<i64: 1>, scalar_prefetch = 0 : i64, scratch_operands = 0 : i64, tpu.core_type = #tpu.core_type<tc>, window_params = [{transform_indices = @transform_0, window_bounds = array<i64: 128, 1152>}, {pipeline_mode = #tpu.pipeline_mode<synchronous>, transform_indices = @transform_1, window_bounds = array<i64: 1152, 256>}, {pipeline_mode = #tpu.pipeline_mode<synchronous>, transform_indices = @transform_2, window_bounds = array<i64: 256, 1024>}, {pipeline_mode = #tpu.pipeline_mode<synchronous>, transform_indices = @transform_3, window_bounds = array<i64: 1, 1024>}, {transform_indices = @transform_4, window_bounds = array<i64: 128, 1024>}]} {
    %c0 = arith.constant 0 : index
    %c0_0 = arith.constant 0 : index
    %0 = vector.load %arg1[%c0, %c0_0] : memref<128x1152xbf16, #tpu.memory_space<vmem>>, vector<128x1152xbf16>
    %c0_1 = arith.constant 0 : index
    %c0_2 = arith.constant 0 : index
    %1 = vector.load %arg2[%c0_1, %c0_2] : memref<1152x256xbf16, #tpu.memory_space<vmem>>, vector<1152x256xbf16>
    %cst = arith.constant dense<0.000000e+00> : vector<128x256xf32>
    %2 = tpu.matmul %0, %1, %cst {dimension_numbers = #tpu.dot_dimension_numbers<[1], [0], [0], [1], [0, 0, 1, 1], [], []>} : vector<128x1152xbf16>, vector<1152x256xbf16>, vector<128x256xf32> -> vector<128x256xf32>
    %cst_3 = arith.constant 0.000000e+00 : f32
    %3 = vector.broadcast %cst_3 : f32 to vector<128x256xf32>
    %4 = arith.maximumf %2, %3 : vector<128x256xf32>
    %5 = arith.truncf %4 : vector<128x256xf32> to vector<128x256xbf16>
    %c0_4 = arith.constant 0 : index
    %c0_5 = arith.constant 0 : index
    %6 = vector.load %arg3[%c0_4, %c0_5] : memref<256x1024xbf16, #tpu.memory_space<vmem>>, vector<256x1024xbf16>
    %cst_6 = arith.constant dense<0.000000e+00> : vector<128x1024xf32>
    %7 = tpu.matmul %5, %6, %cst_6 {dimension_numbers = #tpu.dot_dimension_numbers<[1], [0], [0], [1], [0, 0, 1, 1], [], []>} : vector<128x256xbf16>, vector<256x1024xbf16>, vector<128x1024xf32> -> vector<128x1024xf32>
    %c0_7 = arith.constant 0 : index
    %c0_8 = arith.constant 0 : index
    %8 = vector.load %arg4[%c0_7, %c0_8] : memref<1x1024xf32, #tpu.memory_space<vmem>>, vector<1x1024xf32>
    %9 = vector.broadcast %8 : vector<1x1024xf32> to vector<128x1024xf32>
    %10 = arith.addf %7, %9 : vector<128x1024xf32>
    %11 = arith.truncf %10 : vector<128x1024xf32> to vector<128x1024xbf16>
    %c0_9 = arith.constant 0 : index
    %c0_10 = arith.constant 0 : index
    %12 = vector.load %arg5[%c0_9, %c0_10] : memref<128x1024xbf16, #tpu.memory_space<vmem>>, vector<128x1024xbf16>
    tpu.vector_store %arg5[%c0_9, %c0_10], %11 {strides = array<i32>} : memref<128x1024xbf16, #tpu.memory_space<vmem>>, vector<128x1024xbf16>,
    return
  }
  func.func @transform_0(%arg0: i32) -> (i32, i32) {
    %c0_i32 = arith.constant 0 : i32
    %c0_i32_0 = arith.constant 0 : i32
    return %arg0, %c0_i32 : i32, i32
  }
  func.func @transform_1(%arg0: i32) -> (i32, i32) {
    %c0_i32 = arith.constant 0 : i32
    %c0_i32_0 = arith.constant 0 : i32
    %c0_i32_1 = arith.constant 0 : i32
    return %c0_i32, %c0_i32_0 : i32, i32
  }
  func.func @transform_2(%arg0: i32) -> (i32, i32) {
    %c0_i32 = arith.constant 0 : i32
    %c0_i32_0 = arith.constant 0 : i32
    %c0_i32_1 = arith.constant 0 : i32
    return %c0_i32, %c0_i32_0 : i32, i32
  }
  func.func @transform_3(%arg0: i32) -> (i32, i32) {
    %c0_i32 = arith.constant 0 : i32
    %c0_i32_0 = arith.constant 0 : i32
    %c0_i32_1 = arith.constant 0 : i32
    return %c0_i32, %c0_i32_0 : i32, i32
  }
  func.func @transform_4(%arg0: i32) -> (i32, i32) {
    %c0_i32 = arith.constant 0 : i32
    %c0_i32_0 = arith.constant 0 : i32
    return %arg0, %c0_i32 : i32, i32
  }
}

</mosaic_0001>

<bundles_post_ra>
// kernel: tpu_custom_call.1
= control target key start
LH: loop header
LB: loop body
LE: loop exit
PB: predicated region body
PF: predicated region fallthrough
CT: control target
= control target key end

     0   :  { %9 = vsyncpa [#allocation3], 0  ;;  %s5539_s0 = inlined_call_operand.hbm [shape: bf16[128,1152], index: 0, kind: input, shape index: {}]   ;;  %s5540_s1 = inlined_call_operand.hbm [shape: bf16[1152,256], index: 1, kind: input, shape index: {}]   ;;  %s5541_s2 = inlined_call_operand.hbm [shape: bf16[256,1024], index: 2, kind: input, shape index: {}]   ;;  %s5542_s3 = inlined_call_operand.hbm [shape: f32[1,1024], index: 3, kind: input, shape index: {}]   ;;  %s5543_s4 = inlined_call_operand.hbm [shape: bf16[128,1024], index: 4, kind: output, shape index: {}]  }
   0x1   :  { %10 = vsyncpa [#allocation6], 0 }
   0x2   :  { %11 = vsyncpa [#allocation9], 0 }
   0x3   :  { %12 = vsyncpa [#allocation4], 0  ;;  %s4670_s15 = smov [#allocation5]  }
   0x4   :  { %s30_s16 = sshll.u32 %s4670_s15, 4  ;;  %s31_s16 = int_to_ptr.vmem [resolvable:$true] %s30_s16 }
   0x5   :  { %s4570_s17 = scalar_lea.vmem %s31_s16, 18432  ;;  %p4575_p1 = scmp.lt.s32.totalorder %s31_s16, %s31_s16 }
   0x6   :  { %p4571_p0 = scmp.ne.s32.totalorder %s31_s16, %s4570_s17  ;;  %p4576_p2 = scmp.lt.s32.totalorder %s4570_s17, %s4570_s17 }
   0x8   :  { %p4577_p3 = por %p4576_p2, %p4575_p1 }
   0xa   :  { %p4578_p4 = pnand %p4577_p3, %p4571_p0 }
   0xc   :  { %4581 = shalt.err (!%p4578_p4)
}
   0xd   :  { %s4671_s18 = smov 128   ;;  %s4672_s19 = smov 8  }
   0xe   :  { %36 = dma.hbm_to_vmem [thread:$0]  %s5540_s1, 18432, %s31_s16, [#allocation6], %s4671_s18, %s4671_s18, %s4672_s19  }
   0xf   :  { %s4673_s22 = smov [#allocation2]  }
  0x10   :  { %s18_s23 = sshll.u32 %s4673_s22, 4  ;;  %s19_s23 = int_to_ptr.vmem [resolvable:$true] %s18_s23 }
  0x11   :  { %s4590_s24 = scalar_lea.vmem %s19_s23, 9216  ;;  %p4595_p6 = scmp.lt.s32.totalorder %s19_s23, %s19_s23 }
  0x12   :  { %p4591_p5 = scmp.ne.s32.totalorder %s19_s23, %s4590_s24  ;;  %p4596_p7 = scmp.lt.s32.totalorder %s4590_s24, %s4590_s24 }
  0x14   :  { %p4597_p8 = por %p4596_p7, %p4595_p6 }
  0x16   :  { %p4598_p9 = pnand %p4597_p8, %p4591_p5 }
  0x18   :  { %4601 = shalt.err (!%p4598_p9)
}
  0x19   :  { %s4674_s25 = smov 576   ;;  %s4675_s26 = smov 36  }
  0x1a   :  { %24 = dma.hbm_to_vmem [thread:$0]  %s5539_s0, 9216, %s19_s23, [#allocation3], %s4674_s25, %s4674_s25, %s4675_s26  }
  0x1b   :  { %s4676_s29 = smov [#allocation7]  }
  0x1c   :  { %s42_s30 = sshll.u32 %s4676_s29, 4  ;;  %s43_s30 = int_to_ptr.vmem [resolvable:$true] %s42_s30 }
  0x1d   :  { %s4610_s1 = scalar_lea.vmem %s43_s30, 16384  ;;  %p4615_p11 = scmp.lt.s32.totalorder %s43_s30, %s43_s30 }
  0x1e   :  { %p4611_p10 = scmp.ne.s32.totalorder %s43_s30, %s4610_s1  ;;  %p4616_p12 = scmp.lt.s32.totalorder %s4610_s1, %s4610_s1 }
  0x20   :  { %p4617_p13 = por %p4616_p12, %p4615_p11 }
  0x22   :  { %p4618_p0 = pnand %p4617_p13, %p4611_p10 }
  0x24   :  { %4621 = shalt.err (!%p4618_p0)
}
  0x25   :  { %s4677_s5 = smov 512   ;;  %s4678_s6 = smov 32  }
  0x26   :  { %48 = dma.hbm_to_vmem [thread:$0]  %s5541_s2, 16384, %s43_s30, [#allocation6], %s4677_s5, %s4677_s5, %s4678_s6  }
  0x27   :  { %s4679_s0 = smov [#allocation8]  }
  0x28   :  { %s55_s9 = sshll.u32 %s4679_s0, 4  ;;  %s56_s9 = int_to_ptr.vmem [resolvable:$true] %s55_s9 }
  0x29   :  { %s4630_s10 = scalar_lea.vmem %s56_s9, 128  ;;  %p4635_p2 = scmp.lt.s32.totalorder %s56_s9, %s56_s9 }
  0x2a   :  { %p4631_p1 = scmp.ne.s32.totalorder %s56_s9, %s4630_s10  ;;  %p4636_p3 = scmp.lt.s32.totalorder %s4630_s10, %s4630_s10 }
  0x2c   :  { %p4637_p4 = por %p4636_p3, %p4635_p2 }
  0x2e   :  { %p4638_p5 = pnand %p4637_p4, %p4631_p1 }
  0x30   :  { %4641 = shalt.err (!%p4638_p5)
}
  0x31   :  { %58 = dma.hbm_to_vmem [thread:$0]  %s5542_s3, 128, %s56_s9, [#allocation9]  }
  0x32   :  { %4662 = dma.done.wait [#allocation3], 9216  }
  0x33   :  { %4663 = vsyncadd [#allocation3], 4294958080 }
  0x34   :  { %4664 = dma.done.wait [#allocation6], 34816  }
  0x35   :  { %4665 = vsyncadd [#allocation6], 4294932480 }
  0x36   :  { %4666 = dma.done.wait [#allocation9], 128  }
  0x37   :  { %4667 = vsyncadd [#allocation9], 4294967168  ;;  %v4242_v0 = vld [vmem:[#allocation5 + $0x74] ss:$8 sps:$4 sm:$0xff]   ;;  %v4246_v2 = vld [vmem:[#allocation5 + $0x70] ss:$8 sps:$4 sm:$0xff]  }
  0x38   :  { %v4244_v1 = vld [vmem:[#allocation5 + $0x174] ss:$8 sps:$4 sm:$0xff]   ;;  %1384 = vmatprep.subr.bf16.mxu0 %v4242_v0  ;;  %v4247_v3 = vld [vmem:[#allocation5 + $0x170] ss:$8 sps:$4 sm:$0xff]   ;;  %v4248_v4 = vld [vmem:[#allocation5 + $0x64] ss:$8 sps:$4 sm:$0xff]  }
  0x39   :  { %1497 = vmatprep.subr.bf16.mxu1 %v4244_v1  ;;  %1385 = vmatpush1.bf16.msra.mxu0 %v4246_v2  ;;  %v4250_v5 = vld [vmem:[#allocation5 + $0x164] ss:$8 sps:$4 sm:$0xff]   ;;  %v4252_v6 = vld [vmem:[#allocation5 + $0x60] ss:$8 sps:$4 sm:$0xff]   ;;  %v4254_v8 = vld [vmem:[#allocation5 + $0x54] ss:$8 sps:$4 sm:$0xff]  }
  0x3a   :  { %1498 = vmatpush1.bf16.msra.mxu1 %v4247_v3  ;;  %1386 = vmatprep.subr.bf16.mxu0 %v4248_v4  ;;  %v4253_v7 = vld [vmem:[#allocation5 + $0x160] ss:$8 sps:$4 sm:$0xff]   ;;  %v4256_v9 = vld [vmem:[#allocation5 + $0x154] ss:$8 sps:$4 sm:$0xff]   ;;  %v4258_v10 = vld [vmem:[#allocation5 + $0x50] ss:$8 sps:$4 sm:$0xff]  }
  0x3b   :  { %1499 = vmatprep.subr.bf16.mxu1 %v4250_v5  ;;  %v4259_v11 = vld [vmem:[#allocation5 + $0x150] ss:$8 sps:$4 sm:$0xff]   ;;  %v4260_v12 = vld [vmem:[#allocation5 + $0x44] ss:$8 sps:$4 sm:$0xff]   ;;  %v4264_v14 = vld [vmem:[#allocation5 + $0x40] ss:$8 sps:$4 sm:$0xff]  }
  0x3c   :  { %v4262_v13 = vld [vmem:[#allocation5 + $0x144] ss:$8 sps:$4 sm:$0xff]   ;;  %v4265_v15 = vld [vmem:[#allocation5 + $0x140] ss:$8 sps:$4 sm:$0xff]   ;;  %v4266_v16 = vld [vmem:[#allocation5 + $0x34] ss:$8 sps:$4 sm:$0xff]  }
  0x3d   :  { %1387 = vmatpush1.bf16.msra.mxu0 %v4252_v6  ;;  %v4268_v17 = vld [vmem:[#allocation5 + $0x134] ss:$8 sps:$4 sm:$0xff]   ;;  %v4270_v18 = vld [vmem:[#allocation5 + $0x30] ss:$8 sps:$4 sm:$0xff]   ;;  %v4272_v20 = vld [vmem:[#allocation5 + $0x24] ss:$8 sps:$4 sm:$0xff]  }
  0x3e   :  { %1500 = vmatpush1.bf16.msra.mxu1 %v4253_v7  ;;  %1388 = vmatprep.subr.bf16.mxu0 %v4254_v8  ;;  %v4271_v19 = vld [vmem:[#allocation5 + $0x130] ss:$8 sps:$4 sm:$0xff]   ;;  %v4274_v21 = vld [vmem:[#allocation5 + $0x124] ss:$8 sps:$4 sm:$0xff]   ;;  %v4276_v22 = vld [vmem:[#allocation5 + $0x20] ss:$8 sps:$4 sm:$0xff]  }
  0x3f   :  { %1501 = vmatprep.subr.bf16.mxu1 %v4256_v9  ;;  %v4277_v23 = vld [vmem:[#allocation5 + $0x120] ss:$8 sps:$4 sm:$0xff]   ;;  %v4278_v24 = vld [vmem:[#allocation5 + $0x14] ss:$8 sps:$4 sm:$0xff]   ;;  %v4282_v26 = vld [vmem:[#allocation5 + $0x10] ss:$8 sps:$4 sm:$0xff]  }
  0x40   :  { %v4280_v25 = vld [vmem:[#allocation5 + $0x114] ss:$8 sps:$4 sm:$0xff]   ;;  %v4283_v27 = vld [vmem:[#allocation5 + $0x110] ss:$8 sps:$4 sm:$0xff]   ;;  %v4284_v28 = vld [vmem:[#allocation5 + $0x4] ss:$8 sps:$4 sm:$0xff]  }
  0x41   :  { %1389 = vmatpush1.bf16.msra.mxu0 %v4258_v10  ;;  %v4286_v29 = vld [vmem:[#allocation5 + $0x104] ss:$8 sps:$4 sm:$0xff]   ;;  %v4288_v30 = vld [vmem:[#allocation5] ss:$8 sps:$4 sm:$0xff]   ;;  %v4290_v32 = vld [vmem:[#allocation5 + $0xf4] ss:$8 sps:$4 sm:$0xff]  }
  0x42   :  { %1502 = vmatpush1.bf16.msra.mxu1 %v4259_v11  ;;  %1390 = vmatprep.subr.bf16.mxu0 %v4260_v12  ;;  %v4289_v31 = vld [vmem:[#allocation5 + $0x100] ss:$8 sps:$4 sm:$0xff]   ;;  %v4292_v33 = vld [vmem:[#allocation5 + $0x1f4] ss:$8 sps:$4 sm:$0xff]   ;;  %v4294_v34 = vld [vmem:[#allocation5 + $0xf0] ss:$8 sps:$4 sm:$0xff]  }
  0x43   :  { %1503 = vmatprep.subr.bf16.mxu1 %v4262_v13  ;;  %v4295_v35 = vld [vmem:[#allocation5 + $0x1f0] ss:$8 sps:$4 sm:$0xff]   ;;  %v4296_v36 = vld [vmem:[#allocation5 + $0xe4] ss:$8 sps:$4 sm:$0xff]   ;;  %v4300_v38 = vld [vmem:[#allocation5 + $0xe0] ss:$8 sps:$4 sm:$0xff]  }
  0x44   :  { %v4298_v37 = vld [vmem:[#allocation5 + $0x1e4] ss:$8 sps:$4 sm:$0xff]   ;;  %v4301_v39 = vld [vmem:[#allocation5 + $0x1e0] ss:$8 sps:$4 sm:$0xff]   ;;  %v4302_v40 = vld [vmem:[#allocation5 + $0xd4] ss:$8 sps:$4 sm:$0xff]  }
  0x45   :  { %1391 = vmatpush1.bf16.msra.mxu0 %v4264_v14  ;;  %v4304_v41 = vld [vmem:[#allocation5 + $0x1d4] ss:$8 sps:$4 sm:$0xff]   ;;  %v4306_v42 = vld [vmem:[#allocation5 + $0xd0] ss:$8 sps:$4 sm:$0xff]   ;;  %v4308_v44 = vld [vmem:[#allocation5 + $0xc4] ss:$8 sps:$4 sm:$0xff]  }
  0x46   :  { %1504 = vmatpush1.bf16.msra.mxu1 %v4265_v15  ;;  %1392 = vmatprep.subr.bf16.mxu0 %v4266_v16  ;;  %v4307_v43 = vld [vmem:[#allocation5 + $0x1d0] ss:$8 sps:$4 sm:$0xff]   ;;  %v4310_v45 = vld [vmem:[#allocation5 + $0x1c4] ss:$8 sps:$4 sm:$0xff]   ;;  %v4312_v46 = vld [vmem:[#allocation5 + $0xc0] ss:$8 sps:$4 sm:$0xff]  }
  0x47   :  { %1505 = vmatprep.subr.bf16.mxu1 %v4268_v17  ;;  %v4313_v47 = vld [vmem:[#allocation5 + $0x1c0] ss:$8 sps:$4 sm:$0xff]   ;;  %v4314_v48 = vld [vmem:[#allocation5 + $0xb4] ss:$8 sps:$4 sm:$0xff]   ;;  %v4343_v51 = vld [vmem:[#allocation2 + $0xc] ss:$36 sps:$4 sm:$0xff]  }
  0x48   :  { %v4340_v49 = vld [vmem:[#allocation2 + $0x4] ss:$36 sps:$4 sm:$0xff]   ;;  %v4316_v50 = vld [vmem:[#allocation5 + $0x1b4] ss:$8 sps:$4 sm:$0xff]   ;;  %v4318_v52 = vld [vmem:[#allocation5 + $0xb0] ss:$8 sps:$4 sm:$0xff]   ;;  %1529 = vmatprep.mubr.bf16.mxu1 %v4343_v51 }
  0x49   :  { %1393 = vmatpush1.bf16.msra.mxu0 %v4270_v18  ;;  %1416 = vmatprep.mubr.bf16.mxu0 %v4340_v49  ;;  %v4319_v53 = vld [vmem:[#allocation5 + $0x1b0] ss:$8 sps:$4 sm:$0xff]   ;;  %v4320_v54 = vld [vmem:[#allocation5 + $0xa4] ss:$8 sps:$4 sm:$0xff]   ;;  %v4324_v56 = vld [vmem:[#allocation5 + $0xa0] ss:$8 sps:$4 sm:$0xff]  }
  0x4a   :  { %1506 = vmatpush1.bf16.msra.mxu1 %v4271_v19  ;;  %1394 = vmatprep.subr.bf16.mxu0 %v4272_v20  ;;  %v4322_v55 = vld [vmem:[#allocation5 + $0x1a4] ss:$8 sps:$4 sm:$0xff]   ;;  %v4325_v57 = vld [vmem:[#allocation5 + $0x1a0] ss:$8 sps:$4 sm:$0xff]   ;;  %v4326_v58 = vld [vmem:[#allocation5 + $0x94] ss:$8 sps:$4 sm:$0xff]  }
  0x4b   :  { %1507 = vmatprep.subr.bf16.mxu1 %v4274_v21  ;;  %v4328_v59 = vld [vmem:[#allocation5 + $0x194] ss:$8 sps:$4 sm:$0xff]   ;;  %v4330_v60 = vld [vmem:[#allocation5 + $0x90] ss:$8 sps:$4 sm:$0xff]   ;;  %v4332_v62 = vld [vmem:[#allocation5 + $0x84] ss:$8 sps:$4 sm:$0xff]  }
  0x4c   :  { %v4331_v61 = vld [vmem:[#allocation5 + $0x190] ss:$8 sps:$4 sm:$0xff]   ;;  %v4334_v63 = vld [vmem:[#allocation5 + $0x184] ss:$8 sps:$4 sm:$0xff]   ;;  %v4336_v0 = vld [vmem:[#allocation5 + $0x80] ss:$8 sps:$4 sm:$0xff]  }
  0x4d   :  { %1395 = vmatpush1.bf16.msra.mxu0 %v4276_v22  ;;  %v4337_v1 = vld [vmem:[#allocation5 + $0x180] ss:$8 sps:$4 sm:$0xff]   ;;  %v4346_v2 = vld [vmem:[#allocation5 + $0x274] ss:$8 sps:$4 sm:$0xff]   ;;  %v4344_v6 = vld [vmem:[#allocation5 + $0x270] ss:$8 sps:$4 sm:$0xff]  }
  0x4e   :  { %1508 = vmatpush1.bf16.msra.mxu1 %v4277_v23  ;;  %1396 = vmatprep.subr.bf16.mxu0 %v4278_v24  ;;  %v4349_v3 = vld [vmem:[#allocation5 + $0x374] ss:$8 sps:$4 sm:$0xff]   ;;  %v4338_v4 = vld [vmem:[#allocation2] ss:$36 sps:$4 sm:$0xff]   ;;  %v4341_v5 = vld [vmem:[#allocation2 + $0x8] ss:$36 sps:$4 sm:$0xff]  }
  0x4f   :  { %1509 = vmatprep.subr.bf16.mxu1 %v4280_v25  ;;  %v4347_v7 = vld [vmem:[#allocation5 + $0x370] ss:$8 sps:$4 sm:$0xff]   ;;  %v4352_v8 = vld [vmem:[#allocation5 + $0x264] ss:$8 sps:$4 sm:$0xff]   ;;  %v4350_v12 = vld [vmem:[#allocation5 + $0x260] ss:$8 sps:$4 sm:$0xff]  }
  0x50   :  { %v4355_v9 = vld [vmem:[#allocation5 + $0x364] ss:$8 sps:$4 sm:$0xff]   ;;  %v4358_v11 = vld [vmem:[#allocation2 + $0x54] ss:$36 sps:$4 sm:$0xff]   ;;  %v4353_v13 = vld [vmem:[#allocation5 + $0x360] ss:$8 sps:$4 sm:$0xff]  }
  0x51   :  { %1397 = vmatpush1.bf16.msra.mxu0 %v4282_v26  ;;  %v4356_v10 = vld [vmem:[#allocation2 + $0x4c] ss:$36 sps:$4 sm:$0xff]   ;;  %v4364_v14 = vld [vmem:[#allocation5 + $0x254] ss:$8 sps:$4 sm:$0xff]   ;;  %v4368_v24 = vld [vmem:[#allocation5 + $0x240] ss:$8 sps:$4 sm:$0xff]  }
  0x52   :  { %1510 = vmatpush1.bf16.msra.mxu1 %v4283_v27  ;;  %1398 = vmatprep.subr.bf16.mxu0 %v4284_v28  ;;  %v4367_v15 = vld [vmem:[#allocation5 + $0x354] ss:$8 sps:$4 sm:$0xff]   ;;  %v4360_v16 = vld [vmem:[#allocation2 + $0x48] ss:$36 sps:$4 sm:$0xff]   ;;  %v4362_v18 = vld [vmem:[#allocation5 + $0x250] ss:$8 sps:$4 sm:$0xff]  }
  0x53   :  { %1511 = vmatprep.subr.bf16.mxu1 %v4286_v29  ;;  %v4361_v17 = vld [vmem:[#allocation2 + $0x50] ss:$36 sps:$4 sm:$0xff]   ;;  %v4370_v20 = vld [vmem:[#allocation5 + $0x244] ss:$8 sps:$4 sm:$0xff]   ;;  %v4376_v23 = vld [vmem:[#allocation2 + $0x9c] ss:$36 sps:$4 sm:$0xff]  }
  0x54   :  { %v4365_v19 = vld [vmem:[#allocation5 + $0x350] ss:$8 sps:$4 sm:$0xff]   ;;  %v4373_v21 = vld [vmem:[#allocation5 + $0x344] ss:$8 sps:$4 sm:$0xff]   ;;  %v4371_v25 = vld [vmem:[#allocation5 + $0x340] ss:$8 sps:$4 sm:$0xff]  }
  0x55   :  { %1399 = vmatpush1.bf16.msra.mxu0 %v4288_v30  ;;  %v4374_v22 = vld [vmem:[#allocation2 + $0x94] ss:$36 sps:$4 sm:$0xff]   ;;  %v4407_v49 = vld [vmem:[#allocation5 + $0x300] ss:$8 sps:$4 sm:$0xff]   ;;  %s4681_s2 = smov [#allocation10]  }
  0x56   :  { %1512 = vmatpush1.bf16.msra.mxu1 %v4289_v31  ;;  %1400 = vmatprep.subr.bf16.mxu0 %v4290_v32  ;;  %v4382_v26 = vld [vmem:[#allocation5 + $0x234] ss:$8 sps:$4 sm:$0xff]   ;;  %v4380_v30 = vld [vmem:[#allocation5 + $0x230] ss:$8 sps:$4 sm:$0xff]   ;;  %v4388_v32 = vld [vmem:[#allocation5 + $0x224] ss:$8 sps:$4 sm:$0xff]  }
  0x57   :  { %1513 = vmatprep.subr.bf16.mxu1 %v4292_v33  ;;  %v4385_v27 = vld [vmem:[#allocation5 + $0x334] ss:$8 sps:$4 sm:$0xff]   ;;  %v4383_v31 = vld [vmem:[#allocation5 + $0x330] ss:$8 sps:$4 sm:$0xff]   ;;  %v4391_v33 = vld [vmem:[#allocation5 + $0x324] ss:$8 sps:$4 sm:$0xff]  }
  0x58   :  { %v4378_v28 = vld [vmem:[#allocation2 + $0x90] ss:$36 sps:$4 sm:$0xff]   ;;  %v4379_v29 = vld [vmem:[#allocation2 + $0x98] ss:$36 sps:$4 sm:$0xff]   ;;  %s3712_s3 = sshll.u32 %s4681_s2, 4  ;;  %s3713_s3 = int_to_ptr.vmem [resolvable:$true] %s3712_s3 }
  0x59   :  { %1401 = vmatpush2.bf16.msra.mxu0 %v4294_v34  ;;  %v4392_v34 = vld [vmem:[#allocation2 + $0xdc] ss:$36 sps:$4 sm:$0xff]   ;;  %s4642_s13 = scalar_lea.vmem %s3713_s3, 8192  ;;  %p4647_p7 = scmp.lt.s32.totalorder %s3713_s3, %s3713_s3 }
  0x5a   :  { %1514 = vmatpush2.bf16.msra.mxu1 %v4295_v35  ;;  %1402 = vmatprep.subr.bf16.mxu0 %v4296_v36  ;;  %v4394_v35 = vld [vmem:[#allocation2 + $0xe4] ss:$36 sps:$4 sm:$0xff]   ;;  %v4421_v51 = vld [vmem:[#allocation5 + $0x3f4] ss:$8 sps:$4 sm:$0xff]   ;;  %p4643_p6 = scmp.ne.s32.totalorder %s3713_s3, %s4642_s13  ;;  %p4648_p8 = scmp.lt.s32.totalorder %s4642_s13, %s4642_s13 }
  0x5b   :  { %1515 = vmatprep.subr.bf16.mxu1 %v4298_v37  ;;  %v4386_v36 = vld [vmem:[#allocation5 + $0x220] ss:$8 sps:$4 sm:$0xff]  }
  0x5c   :  { %v4389_v37 = vld [vmem:[#allocation5 + $0x320] ss:$8 sps:$4 sm:$0xff]   ;;  %p4649_p9 = por %p4648_p8, %p4647_p7 }
  0x5d   :  { %1403 = vmatpush2.bf16.msra.mxu0 %v4300_v38  ;;  %v4400_v38 = vld [vmem:[#allocation5 + $0x214] ss:$8 sps:$4 sm:$0xff]  }
  0x5e   :  { %1516 = vmatpush2.bf16.msra.mxu1 %v4301_v39  ;;  %1404 = vmatprep.subr.bf16.mxu0 %v4302_v40  ;;  %v4403_v39 = vld [vmem:[#allocation5 + $0x314] ss:$8 sps:$4 sm:$0xff]   ;;  %p4650_p10 = pnand %p4649_p9, %p4643_p6 }
  0x5f   :  { %1517 = vmatprep.subr.bf16.mxu1 %v4304_v41  ;;  %v4396_v40 = vld [vmem:[#allocation2 + $0xd8] ss:$36 sps:$4 sm:$0xff]   ;;  %v4397_v41 = vld [vmem:[#allocation2 + $0xe0] ss:$36 sps:$4 sm:$0xff]  }
  0x61   :  { %1405 = vmatpush2.bf16.msra.mxu0 %v4306_v42  ;;  %v4398_v42 = vld [vmem:[#allocation5 + $0x210] ss:$8 sps:$4 sm:$0xff]  }
  0x62   :  { %1518 = vmatpush2.bf16.msra.mxu1 %v4307_v43  ;;  %1406 = vmatprep.subr.bf16.mxu0 %v4308_v44  ;;  %v4401_v43 = vld [vmem:[#allocation5 + $0x310] ss:$8 sps:$4 sm:$0xff]   ;;  %v4406_v44 = vld [vmem:[#allocation5 + $0x204] ss:$8 sps:$4 sm:$0xff]  }
  0x63   :  { %1519 = vmatprep.subr.bf16.mxu1 %v4310_v45  ;;  %v4409_v45 = vld [vmem:[#allocation5 + $0x304] ss:$8 sps:$4 sm:$0xff]  }
  0x65   :  { %1407 = vmatpush2.bf16.msra.mxu0 %v4312_v46  ;;  %v4410_v46 = vld [vmem:[#allocation2 + $0x124] ss:$36 sps:$4 sm:$0xff]  }
  0x66   :  { %1520 = vmatpush2.bf16.msra.mxu1 %v4313_v47  ;;  %1408 = vmatprep.subr.bf16.mxu0 %v4314_v48  ;;  %v4412_v47 = vld [vmem:[#allocation2 + $0x12c] ss:$36 sps:$4 sm:$0xff]   ;;  %v4404_v48 = vld [vmem:[#allocation5 + $0x200] ss:$8 sps:$4 sm:$0xff]  }
  0x67   :  { %1521 = vmatprep.subr.bf16.mxu1 %v4316_v50  ;;  %v4418_v50 = vld [vmem:[#allocation5 + $0x2f4] ss:$8 sps:$4 sm:$0xff]  }
  0x69   :  { %1409 = vmatpush2.bf16.msra.mxu0 %v4318_v52  ;;  %v4414_v52 = vld [vmem:[#allocation2 + $0x120] ss:$36 sps:$4 sm:$0xff]  }
  0x6a   :  { %1522 = vmatpush2.bf16.msra.mxu1 %v4319_v53  ;;  %1410 = vmatprep.subr.bf16.mxu0 %v4320_v54  ;;  %v4415_v53 = vld [vmem:[#allocation2 + $0x128] ss:$36 sps:$4 sm:$0xff]   ;;  %v4416_v54 = vld [vmem:[#allocation5 + $0x2f0] ss:$8 sps:$4 sm:$0xff]  }
  0x6b   :  { %1523 = vmatprep.subr.bf16.mxu1 %v4322_v55  ;;  %v4419_v55 = vld [vmem:[#allocation5 + $0x3f0] ss:$8 sps:$4 sm:$0xff]  }
  0x6d   :  { %1411 = vmatpush2.bf16.msra.mxu0 %v4324_v56  ;;  %v4424_v56 = vld [vmem:[#allocation5 + $0x2e4] ss:$8 sps:$4 sm:$0xff]  }
  0x6e   :  { %1524 = vmatpush2.bf16.msra.mxu1 %v4325_v57  ;;  %1412 = vmatprep.subr.bf16.mxu0 %v4326_v58  ;;  %v4427_v57 = vld [vmem:[#allocation5 + $0x3e4] ss:$8 sps:$4 sm:$0xff]  }
  0x6f   :  { %1525 = vmatprep.subr.bf16.mxu1 %v4328_v59  ;;  %v4428_v58 = vld [vmem:[#allocation2 + $0x16c] ss:$36 sps:$4 sm:$0xff]   ;;  %v4430_v59 = vld [vmem:[#allocation2 + $0x174] ss:$36 sps:$4 sm:$0xff]  }
  0x71   :  { %1413 = vmatpush2.bf16.msra.mxu0 %v4330_v60  ;;  %v4422_v60 = vld [vmem:[#allocation5 + $0x2e0] ss:$8 sps:$4 sm:$0xff]  }
  0x72   :  { %1526 = vmatpush2.bf16.msra.mxu1 %v4331_v61  ;;  %1414 = vmatprep.subr.bf16.mxu0 %v4332_v62  ;;  %v4425_v61 = vld [vmem:[#allocation5 + $0x3e0] ss:$8 sps:$4 sm:$0xff]   ;;  %v4436_v62 = vld [vmem:[#allocation5 + $0x2d4] ss:$8 sps:$4 sm:$0xff]  }
  0x73   :  { %1527 = vmatprep.subr.bf16.mxu1 %v4334_v63  ;;  %v4439_v63 = vld [vmem:[#allocation5 + $0x3d4] ss:$8 sps:$4 sm:$0xff]  }
  0x75   :  { %1415 = vmatpush2.bf16.msra.mxu0 %v4336_v0  ;;  %v4432_v0 = vld [vmem:[#allocation2 + $0x168] ss:$36 sps:$4 sm:$0xff]  }
  0x76   :  { %1528 = vmatpush2.bf16.msra.mxu1 %v4337_v1  ;;  %1610 = vmatprep.subr.bf16.mxu0 %v4346_v2  ;;  %v4433_v1 = vld [vmem:[#allocation2 + $0x170] ss:$36 sps:$4 sm:$0xff]  }
  0x77   :  { %1723 = vmatprep.subr.bf16.mxu1 %v4349_v3  ;;  %v4434_v2 = vld [vmem:[#allocation5 + $0x2d0] ss:$8 sps:$4 sm:$0xff]  }
  0x78   :  { %1417 = vmatmul.mubr.bf16.vlgmr.msra.gmra.mxu0 %v4338_v4  ;;  %v4437_v3 = vld [vmem:[#allocation5 + $0x3d0] ss:$8 sps:$4 sm:$0xff]   ;;  %v4442_v4 = vld [vmem:[#allocation5 + $0x2c4] ss:$8 sps:$4 sm:$0xff]  }
  0x79   :  { %1530 = vmatmul.mubr.bf16.vlgmr.msra.gmra.mxu1 %v4341_v5  ;;  %1611 = vmatpush1.bf16.msra.mxu0 %v4344_v6  ;;  %v4445_v5 = vld [vmem:[#allocation5 + $0x3c4] ss:$8 sps:$4 sm:$0xff]   ;;  %v4446_v6 = vld [vmem:[#allocation2 + $0x1b4] ss:$36 sps:$4 sm:$0xff]  }
  0x7a   :  { %1724 = vmatpush1.bf16.msra.mxu1 %v4347_v7  ;;  %1612 = vmatprep.subr.bf16.mxu0 %v4352_v8  ;;  %v4448_v7 = vld [vmem:[#allocation2 + $0x1bc] ss:$36 sps:$4 sm:$0xff]  }
  0x7b   :  { %1725 = vmatprep.subr.bf16.mxu1 %v4355_v9  ;;  %1426 = vmatprep.mubr.bf16.mxu0 %v4356_v10  ;;  %v4440_v8 = vld [vmem:[#allocation5 + $0x2c0] ss:$8 sps:$4 sm:$0xff]   ;;  %v4454_v10 = vld [vmem:[#allocation5 + $0x2b4] ss:$8 sps:$4 sm:$0xff]  }
  0x7c   :  { %1539 = vmatprep.mubr.bf16.mxu1 %v4358_v11  ;;  %v4443_v9 = vld [vmem:[#allocation5 + $0x3c0] ss:$8 sps:$4 sm:$0xff]   ;;  %v4457_v11 = vld [vmem:[#allocation5 + $0x3b4] ss:$8 sps:$4 sm:$0xff]  }
  0x7d   :  { %1613 = vmatpush1.bf16.msra.mxu0 %v4350_v12  ;;  %v4450_v12 = vld [vmem:[#allocation2 + $0x1b0] ss:$36 sps:$4 sm:$0xff]  }
  0x7e   :  { %1726 = vmatpush1.bf16.msra.mxu1 %v4353_v13  ;;  %1614 = vmatprep.subr.bf16.mxu0 %v4364_v14  ;;  %v4451_v13 = vld [vmem:[#allocation2 + $0x1b8] ss:$36 sps:$4 sm:$0xff]  }
  0x7f   :  { %1727 = vmatprep.subr.bf16.mxu1 %v4367_v15  ;;  %v4452_v14 = vld [vmem:[#allocation5 + $0x2b0] ss:$8 sps:$4 sm:$0xff]  }
  0x80   :  { %1427 = vmatmul.mubr.bf16.gmra.mxu0 %v4360_v16  ;;  %v4455_v15 = vld [vmem:[#allocation5 + $0x3b0] ss:$8 sps:$4 sm:$0xff]   ;;  %v4460_v16 = vld [vmem:[#allocation5 + $0x2a4] ss:$8 sps:$4 sm:$0xff]  }
  0x81   :  { %1540 = vmatmul.mubr.bf16.gmra.mxu1 %v4361_v17  ;;  %1615 = vmatpush1.bf16.msra.mxu0 %v4362_v18  ;;  %v4463_v17 = vld [vmem:[#allocation5 + $0x3a4] ss:$8 sps:$4 sm:$0xff]   ;;  %v4464_v18 = vld [vmem:[#allocation2 + $0x1fc] ss:$36 sps:$4 sm:$0xff]  }
  0x82   :  { %1728 = vmatpush1.bf16.msra.mxu1 %v4365_v19  ;;  %1616 = vmatprep.subr.bf16.mxu0 %v4370_v20  ;;  %v4466_v19 = vld [vmem:[#allocation2 + $0x204] ss:$36 sps:$4 sm:$0xff]  }
  0x83   :  { %1729 = vmatprep.subr.bf16.mxu1 %v4373_v21  ;;  %1436 = vmatprep.mubr.bf16.mxu0 %v4374_v22  ;;  %v4458_v20 = vld [vmem:[#allocation5 + $0x2a0] ss:$8 sps:$4 sm:$0xff]   ;;  %v4472_v22 = vld [vmem:[#allocation5 + $0x294] ss:$8 sps:$4 sm:$0xff]  }
  0x84   :  { %1549 = vmatprep.mubr.bf16.mxu1 %v4376_v23  ;;  %v4461_v21 = vld [vmem:[#allocation5 + $0x3a0] ss:$8 sps:$4 sm:$0xff]   ;;  %v4475_v23 = vld [vmem:[#allocation5 + $0x394] ss:$8 sps:$4 sm:$0xff]  }
  0x85   :  { %1617 = vmatpush1.bf16.msra.mxu0 %v4368_v24  ;;  %v4468_v24 = vld [vmem:[#allocation2 + $0x1f8] ss:$36 sps:$4 sm:$0xff]  }
  0x86   :  { %1730 = vmatpush1.bf16.msra.mxu1 %v4371_v25  ;;  %1618 = vmatprep.subr.bf16.mxu0 %v4382_v26  ;;  %v4469_v25 = vld [vmem:[#allocation2 + $0x200] ss:$36 sps:$4 sm:$0xff]   ;;  %v4470_v26 = vld [vmem:[#allocation5 + $0x290] ss:$8 sps:$4 sm:$0xff]  }
  0x87   :  { %1731 = vmatprep.subr.bf16.mxu1 %v4385_v27  ;;  %v4473_v27 = vld [vmem:[#allocation5 + $0x390] ss:$8 sps:$4 sm:$0xff]  }
  0x88   :  { %1437 = vmatmul.mubr.bf16.gmra.mxu0 %v4378_v28  ;;  %v4478_v28 = vld [vmem:[#allocation5 + $0x284] ss:$8 sps:$4 sm:$0xff]  }
  0x89   :  { %1550 = vmatmul.mubr.bf16.gmra.mxu1 %v4379_v29  ;;  %1619 = vmatpush1.bf16.msra.mxu0 %v4380_v30  ;;  %v4481_v29 = vld [vmem:[#allocation5 + $0x384] ss:$8 sps:$4 sm:$0xff]   ;;  %v4484_v30 = vld [vmem:[#allocation2 + $0x14] ss:$36 sps:$4 sm:$0xff]  }
  0x8a   :  { %1732 = vmatpush1.bf16.msra.mxu1 %v4383_v31  ;;  %1620 = vmatprep.subr.bf16.mxu0 %v4388_v32  ;;  %v4490_v31 = vld [vmem:[#allocation2 + $0x1c] ss:$36 sps:$4 sm:$0xff]  }
  0x8b   :  { %1733 = vmatprep.subr.bf16.mxu1 %v4391_v33  ;;  %1446 = vmatprep.mubr.bf16.mxu0 %v4392_v34  ;;  %v4476_v32 = vld [vmem:[#allocation5 + $0x280] ss:$8 sps:$4 sm:$0xff]   ;;  %v4487_v34 = vld [vmem:[#allocation5 + $0x474] ss:$8 sps:$4 sm:$0xff]  }
  0x8c   :  { %1559 = vmatprep.mubr.bf16.mxu1 %v4394_v35  ;;  %v4479_v33 = vld [vmem:[#allocation5 + $0x380] ss:$8 sps:$4 sm:$0xff]   ;;  %v4482_v35 = vld [vmem:[#allocation2 + $0x10] ss:$36 sps:$4 sm:$0xff]  }
  0x8d   :  { %1621 = vmatpush1.bf16.msra.mxu0 %v4386_v36  ;;  %v4485_v36 = vld [vmem:[#allocation5 + $0x470] ss:$8 sps:$4 sm:$0xff]  }
  0x8e   :  { %1734 = vmatpush1.bf16.msra.mxu1 %v4389_v37  ;;  %1622 = vmatprep.subr.bf16.mxu0 %v4400_v38  ;;  %v4488_v37 = vld [vmem:[#allocation2 + $0x18] ss:$36 sps:$4 sm:$0xff]  }
  0x8f   :  { %1735 = vmatprep.subr.bf16.mxu1 %v4403_v39  ;;  %v4491_v38 = vld [vmem:[#allocation2 + $0x5c] ss:$36 sps:$4 sm:$0xff]   ;;  %v4496_v39 = vld [vmem:[#allocation5 + $0x464] ss:$8 sps:$4 sm:$0xff]  }
  0x90   :  { %1447 = vmatmul.mubr.bf16.gmra.mxu0 %v4396_v40  ;;  %v4497_v40 = vld [vmem:[#allocation2 + $0x64] ss:$36 sps:$4 sm:$0xff]  }
  0x91   :  { %1560 = vmatmul.mubr.bf16.gmra.mxu1 %v4397_v41  ;;  %1623 = vmatpush1.bf16.msra.mxu0 %v4398_v42  ;;  %v4494_v41 = vld [vmem:[#allocation5 + $0x460] ss:$8 sps:$4 sm:$0xff]   ;;  %v4505_v42 = vld [vmem:[#allocation5 + $0x454] ss:$8 sps:$4 sm:$0xff]  }
  0x92   :  { %1736 = vmatpush1.bf16.msra.mxu1 %v4401_v43  ;;  %1624 = vmatprep.subr.bf16.mxu0 %v4406_v44  ;;  %v4493_v43 = vld [vmem:[#allocation2 + $0x58] ss:$36 sps:$4 sm:$0xff]   ;;  %v4499_v44 = vld [vmem:[#allocation2 + $0x60] ss:$36 sps:$4 sm:$0xff]  }
  0x93   :  { %1737 = vmatprep.subr.bf16.mxu1 %v4409_v45  ;;  %1456 = vmatprep.mubr.bf16.mxu0 %v4410_v46  ;;  %v4500_v45 = vld [vmem:[#allocation2 + $0xa4] ss:$36 sps:$4 sm:$0xff]   ;;  %v4506_v46 = vld [vmem:[#allocation2 + $0xac] ss:$36 sps:$4 sm:$0xff]  }
  0x94   :  { %1569 = vmatprep.mubr.bf16.mxu1 %v4412_v47  ;;  %v4503_v47 = vld [vmem:[#allocation5 + $0x450] ss:$8 sps:$4 sm:$0xff]  }
  0x95   :  { %1625 = vmatpush1.bf16.msra.mxu0 %v4404_v48  ;;  %v4514_v48 = vld [vmem:[#allocation5 + $0x444] ss:$8 sps:$4 sm:$0xff]  }
  0x96   :  { %1738 = vmatpush1.bf16.msra.mxu1 %v4407_v49  ;;  %1626 = vmatprep.subr.bf16.mxu0 %v4418_v50  ;;  %v4502_v49 = vld [vmem:[#allocation2 + $0xa0] ss:$36 sps:$4 sm:$0xff]   ;;  %v4508_v50 = vld [vmem:[#allocation2 + $0xa8] ss:$36 sps:$4 sm:$0xff]  }
  0x97   :  { %1739 = vmatprep.subr.bf16.mxu1 %v4421_v51  ;;  %v4512_v51 = vld [vmem:[#allocation5 + $0x440] ss:$8 sps:$4 sm:$0xff]  }
  0x98   :  { %1457 = vmatmul.mubr.bf16.gmra.mxu0 %v4414_v52  ;;  %v4523_v52 = vld [vmem:[#allocation5 + $0x434] ss:$8 sps:$4 sm:$0xff]  }
  0x99   :  { %1570 = vmatmul.mubr.bf16.gmra.mxu1 %v4415_v53  ;;  %1627 = vmatpush2.bf16.msra.mxu0 %v4416_v54  ;;  %v4509_v53 = vld [vmem:[#allocation2 + $0xec] ss:$36 sps:$4 sm:$0xff]   ;;  %v4515_v54 = vld [vmem:[#allocation2 + $0xf4] ss:$36 sps:$4 sm:$0xff]  }
  0x9a   :  { %1740 = vmatpush2.bf16.msra.mxu1 %v4419_v55  ;;  %1628 = vmatprep.subr.bf16.mxu0 %v4424_v56  ;;  %v4521_v55 = vld [vmem:[#allocation5 + $0x430] ss:$8 sps:$4 sm:$0xff]   ;;  %v4532_v56 = vld [vmem:[#allocation5 + $0x424] ss:$8 sps:$4 sm:$0xff]  }
  0x9b   :  { %1741 = vmatprep.subr.bf16.mxu1 %v4427_v57  ;;  %1466 = vmatprep.mubr.bf16.mxu0 %v4428_v58  ;;  %v4530_v57 = vld [vmem:[#allocation5 + $0x420] ss:$8 sps:$4 sm:$0xff]   ;;  %v4541_v58 = vld [vmem:[#allocation5 + $0x414] ss:$8 sps:$4 sm:$0xff]  }
  0x9c   :  { %1579 = vmatprep.mubr.bf16.mxu1 %v4430_v59  ;;  %v4511_v59 = vld [vmem:[#allocation2 + $0xe8] ss:$36 sps:$4 sm:$0xff]  }
  0x9d   :  { %1629 = vmatpush2.bf16.msra.mxu0 %v4422_v60  ;;  %v4517_v60 = vld [vmem:[#allocation2 + $0xf0] ss:$36 sps:$4 sm:$0xff]  }
  0x9e   :  { %1742 = vmatpush2.bf16.msra.mxu1 %v4425_v61  ;;  %1630 = vmatprep.subr.bf16.mxu0 %v4436_v62  ;;  %v4518_v61 = vld [vmem:[#allocation2 + $0x134] ss:$36 sps:$4 sm:$0xff]   ;;  %v4524_v62 = vld [vmem:[#allocation2 + $0x13c] ss:$36 sps:$4 sm:$0xff]  }
  0x9f   :  { %1743 = vmatprep.subr.bf16.mxu1 %v4439_v63  ;;  %v4539_v63 = vld [vmem:[#allocation5 + $0x410] ss:$8 sps:$4 sm:$0xff]  }
  0xa0   :  { %1467 = vmatmul.mubr.bf16.gmra.mxu0 %v4432_v0  ;;  %v4550_v0 = vld [vmem:[#allocation5 + $0x404] ss:$8 sps:$4 sm:$0xff]  }
  0xa1   :  { %1580 = vmatmul.mubr.bf16.gmra.mxu1 %v4433_v1  ;;  %1631 = vmatpush2.bf16.msra.mxu0 %v4434_v2  ;;  %v4548_v1 = vld [vmem:[#allocation5 + $0x400] ss:$8 sps:$4 sm:$0xff]   ;;  %v4520_v2 = vld [vmem:[#allocation2 + $0x130] ss:$36 sps:$4 sm:$0xff]  }
  0xa2   :  { %1744 = vmatpush2.bf16.msra.mxu1 %v4437_v3  ;;  %1632 = vmatprep.subr.bf16.mxu0 %v4442_v4  ;;  %v4526_v3 = vld [vmem:[#allocation2 + $0x138] ss:$36 sps:$4 sm:$0xff]  }
  0xa3   :  { %1745 = vmatprep.subr.bf16.mxu1 %v4445_v5  ;;  %1476 = vmatprep.mubr.bf16.mxu0 %v4446_v6  ;;  %v4527_v4 = vld [vmem:[#allocation2 + $0x17c] ss:$36 sps:$4 sm:$0xff]   ;;  %v4533_v5 = vld [vmem:[#allocation2 + $0x184] ss:$36 sps:$4 sm:$0xff]  }
  0xa4   :  { %1589 = vmatprep.mubr.bf16.mxu1 %v4448_v7  ;;  %v4529_v6 = vld [vmem:[#allocation2 + $0x178] ss:$36 sps:$4 sm:$0xff]   ;;  %v4535_v7 = vld [vmem:[#allocation2 + $0x180] ss:$36 sps:$4 sm:$0xff]  }
  0xa5   :  { %1633 = vmatpush2.bf16.msra.mxu0 %v4440_v8  ;;  %v4536_v8 = vld [vmem:[#allocation2 + $0x1c4] ss:$36 sps:$4 sm:$0xff]  }
  0xa6   :  { %1746 = vmatpush2.bf16.msra.mxu1 %v4443_v9  ;;  %1634 = vmatprep.subr.bf16.mxu0 %v4454_v10  ;;  %v4542_v9 = vld [vmem:[#allocation2 + $0x1cc] ss:$36 sps:$4 sm:$0xff]   ;;  %v4538_v10 = vld [vmem:[#allocation2 + $0x1c0] ss:$36 sps:$4 sm:$0xff]  }
  0xa7   :  { %1747 = vmatprep.subr.bf16.mxu1 %v4457_v11  ;;  %v4544_v11 = vld [vmem:[#allocation2 + $0x1c8] ss:$36 sps:$4 sm:$0xff]  }
  0xa8   :  { %1477 = vmatmul.mubr.bf16.gmra.mxu0 %v4450_v12  ;;  %v4545_v12 = vld [vmem:[#allocation2 + $0x20c] ss:$36 sps:$4 sm:$0xff]  }
  0xa9   :  { %1590 = vmatmul.mubr.bf16.gmra.mxu1 %v4451_v13  ;;  %1635 = vmatpush2.bf16.msra.mxu0 %v4452_v14  ;;  %v4551_v13 = vld [vmem:[#allocation2 + $0x214] ss:$36 sps:$4 sm:$0xff]   ;;  %v4547_v14 = vld [vmem:[#allocation2 + $0x208] ss:$36 sps:$4 sm:$0xff]  }
  0xaa   :  { %1748 = vmatpush2.bf16.msra.mxu1 %v4455_v15  ;;  %1636 = vmatprep.subr.bf16.mxu0 %v4460_v16  ;;  %v4553_v15 = vld [vmem:[#allocation2 + $0x210] ss:$36 sps:$4 sm:$0xff]   ;;  %v4680_v16 = vmov 0  }
  0xab   :  { %1749 = vmatprep.subr.bf16.mxu1 %v4463_v17  ;;  %1486 = vmatprep.mubr.bf16.mxu0 %v4464_v18  ;;  %v4554_v17 = vld [vmem:[#allocation2 + $0x20] ss:$36 sps:$4 sm:$0xff]   ;;  %v4555_v18 = vld [vmem:[#allocation2 + $0x68] ss:$36 sps:$4 sm:$0xff]  }
  0xac   :  { %1599 = vmatprep.mubr.bf16.mxu1 %v4466_v19  ;;  %v2053_v19 = vld [vmem:[#allocation7 + $0x1c0] sm:$0xff] }
  0xad   :  { %1637 = vmatpush2.bf16.msra.mxu0 %v4458_v20  ;;  %v2057_v20 = vld [vmem:[#allocation7 + $0x1e0] sm:$0xff] }
  0xae   :  { %1750 = vmatpush2.bf16.msra.mxu1 %v4461_v21  ;;  %1638 = vmatprep.subr.bf16.mxu0 %v4472_v22  ;;  %v2054_v21 = vld [vmem:[#allocation7 + $0x1c8] sm:$0xff]  ;;  %v4556_v22 = vld [vmem:[#allocation2 + $0xb0] ss:$36 sps:$4 sm:$0xff]  }
  0xaf   :  { %1751 = vmatprep.subr.bf16.mxu1 %v4475_v23  ;;  %v3999_v23 = vcombine.high %v2053_v19, %v2057_v20 }
  0xb0   :  { %1487 = vmatmul.mubr.bf16.gmra.mxu0 %v4468_v24  ;;  %v2058_v24 = vld [vmem:[#allocation7 + $0x1e8] sm:$0xff] }
  0xb1   :  { %1600 = vmatmul.mubr.bf16.gmra.mxu1 %v4469_v25  ;;  %1639 = vmatpush2.bf16.msra.mxu0 %v4470_v26  ;;  %v3998_v25 = vcombine.low %v2053_v19, %v2057_v20  ;;  %v4000_v26 = vcombine.low %v2054_v21, %v2058_v24  ;;  %v2002_v20 = vld [vmem:[#allocation7 + $0x28] sm:$0xff] }
  0xb2   :  { %1752 = vmatpush2.bf16.msra.mxu1 %v4473_v27  ;;  %1640 = vmatprep.subr.bf16.mxu0 %v4478_v28  ;;  %v4001_v27 = vcombine.high %v2054_v21, %v2058_v24  ;;  %v2045_v28 = vld [vmem:[#allocation7 + $0x180] sm:$0xff] }
  0xb3   :  { %1753 = vmatprep.subr.bf16.mxu1 %v4481_v29  ;;  %1642 = vmatprep.mubr.bf16.mxu0 %v4484_v30  ;;  %v2049_v29 = vld [vmem:[#allocation7 + $0x1a0] sm:$0xff]  ;;  %v2046_v30 = vld [vmem:[#allocation7 + $0x188] sm:$0xff] }
  0xb4   :  { %1755 = vmatprep.mubr.bf16.mxu1 %v4490_v31  ;;  %v3991_v31 = vcombine.high %v2045_v28, %v2049_v29  ;;  %v2117_v24 = vld [vmem:[#allocation7 + $0x3c0] sm:$0xff] }
  0xb5   :  { %1641 = vmatpush2.bf16.msra.mxu0 %v4476_v32  ;;  %v2050_v32 = vld [vmem:[#allocation7 + $0x1a8] sm:$0xff] }
  0xb6   :  { %1754 = vmatpush2.bf16.msra.mxu1 %v4479_v33  ;;  %1836 = vmatprep.subr.bf16.mxu0 %v4487_v34  ;;  %v3990_v33 = vcombine.low %v2045_v28, %v2049_v29  ;;  %v3992_v34 = vcombine.low %v2046_v30, %v2050_v32  ;;  %v2122_v29 = vld [vmem:[#allocation7 + $0x3e8] sm:$0xff] }
  0xb7   :  { %2807 = vmatprep.subr.bf16.mxu1 %v3999_v23 }
  0xb8   :  { %1643 = vmatmul.mubr.bf16.vlgmr.msra.gmra.mxu0 %v4482_v35  ;;  %v3993_v35 = vcombine.high %v2046_v30, %v2050_v32 }
  0xb9   :  { %1756 = vmatmul.mubr.bf16.vlgmr.msra.gmra.mxu1 %v4488_v37  ;;  %1837 = vmatpush1.bf16.msra.mxu0 %v4485_v36  ;;  %v2037_v36 = vld [vmem:[#allocation7 + $0x140] sm:$0xff] }
  0xba   :  { %1652 = vmatprep.mubr.bf16.mxu0 %v4491_v38  ;;  %1838 = vmatprep.subr.bf16.mxu0 %v4496_v39  ;;  %v2041_v37 = vld [vmem:[#allocation7 + $0x160] sm:$0xff]  ;;  %v2038_v38 = vld [vmem:[#allocation7 + $0x148] sm:$0xff]  ;;  %v4557_v39 = vld [vmem:[#allocation2 + $0xf8] ss:$36 sps:$4 sm:$0xff]  }
  0xbb   :  { %1765 = vmatprep.mubr.bf16.mxu1 %v4497_v40  ;;  %2808 = vmatpush1.bf16.msra.mxu1 %v3998_v25  ;;  %v3983_v40 = vcombine.high %v2037_v36, %v2041_v37  ;;  %v2121_v25 = vld [vmem:[#allocation7 + $0x3e0] sm:$0xff] }
  0xbc   :  { %2809 = vmatprep.subr.bf16.mxu1 %v3991_v31  ;;  %v4063_v28 = vcombine.high %v2117_v24, %v2121_v25  ;;  %v4062_v30 = vcombine.low %v2117_v24, %v2121_v25 }
  0xbd   :  { %1839 = vmatpush1.bf16.msra.mxu0 %v4494_v41  ;;  %v2042_v41 = vld [vmem:[#allocation7 + $0x168] sm:$0xff] }
  0xbe   :  { %1840 = vmatprep.subr.bf16.mxu0 %v4505_v42  ;;  %v3982_v42 = vcombine.low %v2037_v36, %v2041_v37  ;;  %v2114_v37 = vld [vmem:[#allocation7 + $0x3a8] sm:$0xff] }
  0xbf   :  { %2810 = vmatpush1.bf16.msra.mxu1 %v3990_v33  ;;  %v2109_v33 = vld [vmem:[#allocation7 + $0x380] sm:$0xff] }
  0xc0   :  { %1653 = vmatmul.mubr.bf16.gmra.mxu0 %v4493_v43  ;;  %v3984_v43 = vcombine.low %v2038_v38, %v2042_v41  ;;  %2811 = vmatprep.subr.bf16.mxu1 %v3983_v40 }
  0xc1   :  { %1766 = vmatmul.mubr.bf16.gmra.mxu1 %v4499_v44  ;;  %1662 = vmatprep.mubr.bf16.mxu0 %v4500_v45  ;;  %v3985_v44 = vcombine.high %v2038_v38, %v2042_v41  ;;  %v2029_v45 = vld [vmem:[#allocation7 + $0x100] sm:$0xff] }
  0xc2   :  { %1775 = vmatprep.mubr.bf16.mxu1 %v4506_v46  ;;  %1841 = vmatpush1.bf16.msra.mxu0 %v4503_v47  ;;  %v2033_v46 = vld [vmem:[#allocation7 + $0x120] sm:$0xff]  ;;  %v2030_v47 = vld [vmem:[#allocation7 + $0x108] sm:$0xff] }
  0xc3   :  { %1842 = vmatprep.subr.bf16.mxu0 %v4514_v48  ;;  %2812 = vmatpush1.bf16.msra.mxu1 %v3982_v42  ;;  %v3975_v48 = vcombine.high %v2029_v45, %v2033_v46  ;;  %v2101_v41 = vld [vmem:[#allocation7 + $0x340] sm:$0xff] }
  0xc4   :  { %v2105_v42 = vld [vmem:[#allocation7 + $0x360] sm:$0xff] }
  0xc5   :  { %2813 = vmatprep.subr.bf16.mxu1 %v3975_v48 }
  0xc6   :  { %1843 = vmatpush1.bf16.msra.mxu0 %v4512_v51 }
  0xc7   :  { %1844 = vmatprep.subr.bf16.mxu0 %v4523_v52 }
  0xc8   :  { %1663 = vmatmul.mubr.bf16.gmra.mxu0 %v4502_v49  ;;  %v2034_v49 = vld [vmem:[#allocation7 + $0x128] sm:$0xff] }
  0xc9   :  { %1776 = vmatmul.mubr.bf16.gmra.mxu1 %v4508_v50  ;;  %1672 = vmatprep.mubr.bf16.mxu0 %v4509_v53  ;;  %v3974_v50 = vcombine.low %v2029_v45, %v2033_v46  ;;  %v3976_v51 = vcombine.low %v2030_v47, %v2034_v49  ;;  %v3977_v52 = vcombine.high %v2030_v47, %v2034_v49  ;;  %v2021_v53 = vld [vmem:[#allocation7 + $0xc0] sm:$0xff]  ;;  %v2106_v46 = vld [vmem:[#allocation7 + $0x368] sm:$0xff] }
  0xca   :  { %1785 = vmatprep.mubr.bf16.mxu1 %v4515_v54  ;;  %1845 = vmatpush1.bf16.msra.mxu0 %v4521_v55  ;;  %v2025_v54 = vld [vmem:[#allocation7 + $0xe0] sm:$0xff]  ;;  %v2022_v55 = vld [vmem:[#allocation7 + $0xc8] sm:$0xff]  ;;  %v4047_v45 = vcombine.high %v2101_v41, %v2105_v42  ;;  %v4046_v47 = vcombine.low %v2101_v41, %v2105_v42  ;;  %v4746_v42 = vld [vmem:[#allocation7 + $0x1d0] sm:$0xff] }
  0xcb   :  { %1846 = vmatprep.subr.bf16.mxu0 %v4532_v56  ;;  %2814 = vmatpush1.bf16.msra.mxu1 %v3974_v50  ;;  %v4558_v56 = vld [vmem:[#allocation2 + $0x140] ss:$36 sps:$4 sm:$0xff]  }
  0xcc   :  { %v2097_v50 = vld [vmem:[#allocation7 + $0x320] sm:$0xff] }
  0xce   :  { %1847 = vmatpush1.bf16.msra.mxu0 %v4530_v57  ;;  %v3967_v57 = vcombine.high %v2021_v53, %v2025_v54 }
  0xcf   :  { %1848 = vmatprep.subr.bf16.mxu0 %v4541_v58  ;;  %v2026_v58 = vld [vmem:[#allocation7 + $0xe8] sm:$0xff] }
  0xd0   :  { %1673 = vmatmul.mubr.bf16.gmra.mxu0 %v4511_v59  ;;  %v3966_v59 = vcombine.low %v2021_v53, %v2025_v54  ;;  %2815 = vmatprep.subr.bf16.mxu1 %v3967_v57  ;;  %v2098_v53 = vld [vmem:[#allocation7 + $0x328] sm:$0xff]  ;;  %v2085_v57 = vld [vmem:[#allocation7 + $0x2c0] sm:$0xff] }
  0xd1   :  { %1786 = vmatmul.mubr.bf16.gmra.mxu1 %v4517_v60  ;;  %1682 = vmatprep.mubr.bf16.mxu0 %v4518_v61  ;;  %v3968_v60 = vcombine.low %v2022_v55, %v2026_v58  ;;  %v3969_v61 = vcombine.high %v2022_v55, %v2026_v58  ;;  %v2089_v58 = vld [vmem:[#allocation7 + $0x2e0] sm:$0xff] }
  0xd2   :  { %1795 = vmatprep.mubr.bf16.mxu1 %v4524_v62  ;;  %1849 = vmatpush1.bf16.msra.mxu0 %v4539_v63  ;;  %v2013_v62 = vld [vmem:[#allocation7 + $0x80] sm:$0xff] }
  0xd3   :  { %1850 = vmatprep.subr.bf16.mxu0 %v4550_v0  ;;  %2816 = vmatpush1.bf16.msra.mxu1 %v3966_v59  ;;  %v2017_v63 = vld [vmem:[#allocation7 + $0xa0] sm:$0xff]  ;;  %v2014_v0 = vld [vmem:[#allocation7 + $0x88] sm:$0xff] }
  0xd4   :  { %v2086_v59 = vld [vmem:[#allocation7 + $0x2c8] sm:$0xff] }
  0xd6   :  { %1851 = vmatpush1.bf16.msra.mxu0 %v4548_v1  ;;  %v3959_v1 = vcombine.high %v2013_v62, %v2017_v63 }
  0xd7   :  { %2920 = vmatprep.subr.bf16.mxu0 %v4001_v27  ;;  %v4560_v27 = vld [vmem:[#allocation2 + $0x1d0] ss:$36 sps:$4 sm:$0xff]  }
  0xd8   :  { %1683 = vmatmul.mubr.bf16.gmra.mxu0 %v4520_v2  ;;  %v2018_v2 = vld [vmem:[#allocation7 + $0xa8] sm:$0xff]  ;;  %2817 = vmatprep.subr.bf16.mxu1 %v3959_v1  ;;  %v2077_v1 = vld [vmem:[#allocation7 + $0x280] sm:$0xff] }
  0xd9   :  { %1796 = vmatmul.mubr.bf16.gmra.mxu1 %v4526_v3  ;;  %1692 = vmatprep.mubr.bf16.mxu0 %v4527_v4  ;;  %v3958_v3 = vcombine.low %v2013_v62, %v2017_v63  ;;  %v3960_v4 = vcombine.low %v2014_v0, %v2018_v2  ;;  %v4030_v62 = vcombine.low %v2085_v57, %v2089_v58 }
  0xda   :  { %1805 = vmatprep.mubr.bf16.mxu1 %v4533_v5  ;;  %v3961_v5 = vcombine.high %v2014_v0, %v2018_v2  ;;  %v2081_v2 = vld [vmem:[#allocation7 + $0x2a0] sm:$0xff] }
  0xdb   :  { %2818 = vmatpush1.bf16.msra.mxu1 %v3958_v3  ;;  %v2078_v3 = vld [vmem:[#allocation7 + $0x288] sm:$0xff] }
  0xe0   :  { %1693 = vmatmul.mubr.bf16.gmra.mxu0 %v4529_v6  ;;  %v2005_v6 = vld [vmem:[#allocation7 + $0x40] sm:$0xff] }
  0xe1   :  { %1806 = vmatmul.mubr.bf16.gmra.mxu1 %v4535_v7  ;;  %1702 = vmatprep.mubr.bf16.mxu0 %v4536_v8  ;;  %v2009_v7 = vld [vmem:[#allocation7 + $0x60] sm:$0xff]  ;;  %v2006_v8 = vld [vmem:[#allocation7 + $0x48] sm:$0xff] }
  0xe2   :  { %1815 = vmatprep.mubr.bf16.mxu1 %v4542_v9  ;;  %v4559_v9 = vld [vmem:[#allocation2 + $0x188] ss:$36 sps:$4 sm:$0xff]  }
  0xe8   :  { %1703 = vmatmul.mubr.bf16.gmra.mxu0 %v4538_v10  ;;  %v3951_v10 = vcombine.high %v2005_v6, %v2009_v7 }
  0xe9   :  { %1816 = vmatmul.mubr.bf16.gmra.mxu1 %v4544_v11  ;;  %1712 = vmatprep.mubr.bf16.mxu0 %v4545_v12  ;;  %v2010_v11 = vld [vmem:[#allocation7 + $0x68] sm:$0xff]  ;;  %v3950_v12 = vcombine.low %v2005_v6, %v2009_v7  ;;  %v4023_v6 = vcombine.high %v2077_v1, %v2081_v2 }
  0xea   :  { %1825 = vmatprep.mubr.bf16.mxu1 %v4551_v13  ;;  %v3952_v13 = vcombine.low %v2006_v8, %v2010_v11  ;;  %2819 = vmatprep.subr.bf16.mxu1 %v3951_v10  ;;  %v2082_v7 = vld [vmem:[#allocation7 + $0x2a8] sm:$0xff] }
  0xeb   :  { %2820 = vmatpush1.bf16.msra.mxu1 %v3950_v12  ;;  %v4024_v10 = vcombine.low %v2078_v3, %v2082_v7 }
  0xf0   :  { %1713 = vmatmul.mubr.bf16.gmra.mxu0 %v4547_v14  ;;  %v3953_v14 = vcombine.high %v2006_v8, %v2010_v11  ;;  %v4025_v11 = vcombine.high %v2078_v3, %v2082_v7 }
  0xf1   :  { %1826 = vmatmul.mubr.bf16.gmra.mxu1 %v4553_v15  ;;  %1868 = vmatprep.mubr.bf16.mxu0 %v4680_v16  ;;  %v1997_v15 = vld [vmem:[#allocation7] sm:$0xff] }
  0xf8   :  { %1869 = vmatmul.mubr.bf16.vlgmr.msra.gmra.mxu0 %v4554_v17  ;;  %v2001_v17 = vld [vmem:[#allocation7 + $0x20] sm:$0xff] }
  0xf9   :  { %1878 = vmatprep.mubr.bf16.mxu0 %v4680_v16  ;;  %2921 = vmatpush1.bf16.msra.mxu0 %v4000_v26  ;;  %v3943_v19 = vcombine.high %v1997_v15, %v2001_v17  ;;  %v3942_v21 = vcombine.low %v1997_v15, %v2001_v17  ;;  %v2118_v26 = vld [vmem:[#allocation7 + $0x3c8] sm:$0xff]  ;;  %v2069_v15 = vld [vmem:[#allocation7 + $0x240] sm:$0xff] }
  0xfa   :  { %2922 = vmatprep.subr.bf16.mxu0 %v3993_v35  ;;  %v4064_v31 = vcombine.low %v2118_v26, %v2122_v29  ;;  %v4065_v32 = vcombine.high %v2118_v26, %v2122_v29  ;;  %v2110_v35 = vld [vmem:[#allocation7 + $0x388] sm:$0xff]  ;;  %v2073_v17 = vld [vmem:[#allocation7 + $0x260] sm:$0xff] }
  0xfb   :  { %2821 = vmatprep.subr.bf16.mxu1 %v3943_v19  ;;  %v4057_v40 = vcombine.high %v2110_v35, %v2114_v37  ;;  %v2065_v29 = vld [vmem:[#allocation7 + $0x220] sm:$0xff] }
  0xfc   :  { %2822 = vmatpush1.bf16.msra.mxu1 %v3942_v21  ;;  %v4015_v21 = vcombine.high %v2069_v15, %v2073_v17 }
  0xfd   :  { %2923 = vmatpush1.bf16.msra.mxu0 %v3992_v34  ;;  %2823 = vmatprep.subr.bf16.mxu1 %v4063_v28  ;;  %v2113_v34 = vld [vmem:[#allocation7 + $0x3a0] sm:$0xff] }
  0xfe   :  { %2924 = vmatprep.subr.bf16.mxu0 %v3985_v44  ;;  %v4055_v36 = vcombine.high %v2109_v33, %v2113_v34  ;;  %v4054_v38 = vcombine.low %v2109_v33, %v2113_v34  ;;  %v4561_v44 = vld [vmem:[#allocation2 + $0x218] ss:$36 sps:$4 sm:$0xff]   ;;  %v2061_v28 = vld [vmem:[#allocation7 + $0x200] sm:$0xff]  ;;  %v2066_v34 = vld [vmem:[#allocation7 + $0x228] sm:$0xff] }
  0xff   :  { %v4007_v33 = vcombine.high %v2061_v28, %v2065_v29 }
 0x100   :  { %1879 = vmatmul.mubr.bf16.gmra.mxu0 %v4555_v18  ;;  %v1998_v18 = vld [vmem:[#allocation7 + $0x8] sm:$0xff]  ;;  %2824 = vmatpush2.bf16.msra.mxu1 %v4062_v30 }
 0x101   :  { %1888 = vmatprep.mubr.bf16.mxu0 %v4680_v16  ;;  %2925 = vmatpush1.bf16.msra.mxu0 %v3984_v43  ;;  %v3945_v23 = vcombine.high %v1998_v18, %v2002_v20  ;;  %v2102_v43 = vld [vmem:[#allocation7 + $0x348] sm:$0xff] }
 0x102   :  { %2926 = vmatprep.subr.bf16.mxu0 %v3977_v52  ;;  %2825 = vmatprep.subr.bf16.mxu1 %v4055_v36  ;;  %v4048_v48 = vcombine.low %v2102_v43, %v2106_v46  ;;  %v4049_v49 = vcombine.high %v2102_v43, %v2106_v46  ;;  %v2062_v30 = vld [vmem:[#allocation7 + $0x208] sm:$0xff]  ;;  %v4006_v36 = vcombine.low %v2061_v28, %v2065_v29  ;;  %v4748_v43 = vld [vmem:[#allocation7 + $0x1f0] sm:$0xff] }
 0x104   :  { %2826 = vmatpush2.bf16.msra.mxu1 %v4054_v38  ;;  %v4009_v38 = vcombine.high %v2062_v30, %v2066_v34 }
 0x105   :  { %2927 = vmatpush1.bf16.msra.mxu0 %v3976_v51  ;;  %2827 = vmatprep.subr.bf16.mxu1 %v4047_v45  ;;  %v2094_v51 = vld [vmem:[#allocation7 + $0x308] sm:$0xff] }
 0x106   :  { %2928 = vmatprep.subr.bf16.mxu0 %v3969_v61  ;;  %v4040_v55 = vcombine.low %v2094_v51, %v2098_v53  ;;  %v2090_v61 = vld [vmem:[#allocation7 + $0x2e8] sm:$0xff] }
 0x107   :  { %v4032_v63 = vcombine.low %v2086_v59, %v2090_v61  ;;  %v4033_v0 = vcombine.high %v2086_v59, %v2090_v61 }
 0x108   :  { %1889 = vmatmul.mubr.bf16.gmra.mxu0 %v4556_v22  ;;  %v3944_v22 = vcombine.low %v1998_v18, %v2002_v20  ;;  %2828 = vmatpush2.bf16.msra.mxu1 %v4046_v47  ;;  %v2070_v18 = vld [vmem:[#allocation7 + $0x248] sm:$0xff]  ;;  %v4003_v47 = vcombine.high %v4746_v42, %v4748_v43 }
 0x109   :  { %1898 = vmatprep.mubr.bf16.mxu0 %v4680_v16  ;;  %2929 = vmatpush1.bf16.msra.mxu0 %v3968_v60  ;;  %v4031_v60 = vcombine.high %v2085_v57, %v2089_v58 }
 0x10a   :  { %2930 = vmatprep.subr.bf16.mxu0 %v3961_v5 }
 0x10d   :  { %2931 = vmatpush1.bf16.msra.mxu0 %v3960_v4 }
 0x10e   :  { %2932 = vmatprep.subr.bf16.mxu0 %v3953_v14 }
 0x110   :  { %1899 = vmatmul.mubr.bf16.gmra.mxu0 %v4557_v39  ;;  %v4056_v39 = vcombine.low %v2110_v35, %v2114_v37  ;;  %v4008_v37 = vcombine.low %v2062_v30, %v2066_v34 }
 0x111   :  { %1908 = vmatprep.mubr.bf16.mxu0 %v4680_v16  ;;  %2933 = vmatpush1.bf16.msra.mxu0 %v3952_v13 }
 0x112   :  { %2934 = vmatprep.subr.bf16.mxu0 %v3945_v23  ;;  %v4014_v23 = vcombine.low %v2069_v15, %v2073_v17 }
 0x115   :  { %2935 = vmatpush1.bf16.msra.mxu0 %v3944_v22  ;;  %v2074_v22 = vld [vmem:[#allocation7 + $0x268] sm:$0xff] }
 0x116   :  { %2936 = vmatprep.subr.bf16.mxu0 %v4065_v32  ;;  %v4016_v24 = vcombine.low %v2070_v18, %v2074_v22  ;;  %v4017_v25 = vcombine.high %v2070_v18, %v2074_v22 }
 0x118   :  { %1909 = vmatmul.mubr.bf16.gmra.mxu0 %v4558_v56  ;;  %v4041_v56 = vcombine.high %v2094_v51, %v2098_v53 }
 0x119   :  { %1918 = vmatprep.mubr.bf16.mxu0 %v4680_v16  ;;  %2937 = vmatpush2.bf16.msra.mxu0 %v4064_v31 }
 0x11a   :  { %2938 = vmatprep.subr.bf16.mxu0 %v4057_v40 }
 0x11d   :  { %2939 = vmatpush2.bf16.msra.mxu0 %v4056_v39 }
 0x11e   :  { %2940 = vmatprep.subr.bf16.mxu0 %v4049_v49 }
 0x120   :  { %1919 = vmatmul.mubr.bf16.gmra.mxu0 %v4559_v9  ;;  %v4022_v9 = vcombine.low %v2077_v1, %v2081_v2 }
 0x121   :  { %1928 = vmatprep.mubr.bf16.mxu0 %v4680_v16  ;;  %2941 = vmatpush2.bf16.msra.mxu0 %v4048_v48  ;;  %v2060_v48 = vld [vmem:[#allocation7 + $0x1f8] sm:$0xff] }
 0x122   :  { %2942 = vmatprep.subr.bf16.mxu0 %v4041_v56 }
 0x125   :  { %2943 = vmatpush2.bf16.msra.mxu0 %v4040_v55 }
 0x126   :  { %2944 = vmatprep.subr.bf16.mxu0 %v4033_v0 }
 0x128   :  { %1929 = vmatmul.mubr.bf16.gmra.mxu0 %v4560_v27 }
 0x129   :  { %1938 = vmatprep.mubr.bf16.mxu0 %v4680_v16  ;;  %v2093_v16 = vld [vmem:[#allocation7 + $0x300] sm:$0xff]  ;;  %2945 = vmatpush2.bf16.msra.mxu0 %v4032_v63 }
 0x12a   :  { %v4039_v52 = vcombine.high %v2093_v16, %v2097_v50  ;;  %v4038_v54 = vcombine.low %v2093_v16, %v2097_v50  ;;  %2946 = vmatprep.subr.bf16.mxu0 %v4025_v11 }
 0x12c   :  { %2829 = vmatprep.subr.bf16.mxu1 %v4039_v52 }
 0x12d   :  { %2830 = vmatpush2.bf16.msra.mxu1 %v4038_v54  ;;  %2947 = vmatpush2.bf16.msra.mxu0 %v4024_v10 }
 0x12e   :  { %2831 = vmatprep.subr.bf16.mxu1 %v4031_v60  ;;  %2948 = vmatprep.subr.bf16.mxu0 %v4017_v25 }
 0x130   :  { %1939 = vmatmul.mubr.bf16.gmra.mxu0 %v4561_v44  ;;  %v2056_v44 = vld [vmem:[#allocation7 + $0x1d8] sm:$0xff] }
 0x131   :  { %2832 = vmatpush2.bf16.msra.mxu1 %v4030_v62  ;;  %2949 = vmatpush2.bf16.msra.mxu0 %v4016_v24  ;;  %v4758_v16 = vcombine.low %v2056_v44, %v2060_v48  ;;  %v4760_v50 = vcombine.high %v2056_v44, %v2060_v48 }
 0x132   :  { %2833 = vmatprep.subr.bf16.mxu1 %v4023_v6  ;;  %2950 = vmatprep.subr.bf16.mxu0 %v4009_v38 }
 0x133   :  { %5552 = vst [vmem:[#allocation15_spill] sm:$0xff] %v4760_v50 }
 0x135   :  { %2834 = vmatpush2.bf16.msra.mxu1 %v4022_v9  ;;  %2951 = vmatpush2.bf16.msra.mxu0 %v4008_v37 }
 0x136   :  { %2835 = vmatprep.subr.bf16.mxu1 %v4015_v21  ;;  %3146 = vmatprep.subr.bf16.mxu0 %v4760_v50 }
 0x138   :  { %v1418_v4 = vpop.f32.mrf.mxu0 }
 0x139   :  { %v1531_v5 = vpop.f32.mrf.mxu1  ;;  %2836 = vmatpush2.bf16.msra.mxu1 %v4014_v23 }
 0x13a   :  { %v4730_v8 = vadd.f32 %v1531_v5, %v1418_v4  ;;  %v1420_v12 = vpop.f32.mrf.mxu0  ;;  %2837 = vmatprep.subr.bf16.mxu1 %v4007_v33 }
 0x13b   :  { %v1533_v13 = vpop.f32.mrf.mxu1 }
 0x13c   :  { %v4732_v14 = vadd.f32 %v1533_v13, %v1420_v12  ;;  %v4734_v19 = vpop.f32.mrf.mxu0 }
 0x13d   :  { %v4736_v20 = vpop.f32.mrf.mxu1  ;;  %2838 = vmatpush2.bf16.msra.mxu1 %v4006_v36 }
 0x13e   :  { %v4738_v26 = vpop.f32.mrf.mxu0  ;;  %3033 = vmatprep.subr.bf16.mxu1 %v4003_v47 }
 0x13f   :  { %v4740_v27 = vpop.f32.mrf.mxu1 }
 0x140   :  { %v1428_v31 = vpop.f32.mrf.mxu0 }
 0x141   :  { %v1541_v32 = vpop.f32.mrf.mxu1 }
 0x142   :  { %v4742_v35 = vadd.f32 %v1541_v32, %v1428_v31  ;;  %v1430_v39 = vpop.f32.mrf.mxu0 }
 0x143   :  { %v1543_v40 = vpop.f32.mrf.mxu1 }
 0x144   :  { %v4744_v41 = vadd.f32 %v1543_v40, %v1430_v39  ;;  %v4750_v45 = vpop.f32.mrf.mxu0 }
 0x145   :  { %v4752_v46 = vpop.f32.mrf.mxu1 }
 0x146   :  { %v4762_v51 = vpop.f32.mrf.mxu0 }
 0x147   :  { %v4764_v52 = vpop.f32.mrf.mxu1 }
 0x148   :  { %v1438_v53 = vpop.f32.mrf.mxu0 }
 0x149   :  { %v1551_v54 = vpop.f32.mrf.mxu1 }
 0x14a   :  { %v4767_v55 = vadd.f32 %v1551_v54, %v1438_v53  ;;  %v1440_v56 = vpop.f32.mrf.mxu0 }
 0x14b   :  { %v1553_v57 = vpop.f32.mrf.mxu1 }
 0x14c   :  { %v4769_v58 = vadd.f32 %v1553_v57, %v1440_v56  ;;  %v4771_v59 = vpop.f32.mrf.mxu0 }
 0x14d   :  { %v4773_v60 = vpop.f32.mrf.mxu1 }
 0x14e   :  { %v4775_v61 = vpop.f32.mrf.mxu0 }
 0x14f   :  { %v4777_v62 = vpop.f32.mrf.mxu1 }
 0x150   :  { %v1448_v63 = vpop.f32.mrf.mxu0 }
 0x151   :  { %v1561_v0 = vpop.f32.mrf.mxu1 }
 0x152   :  { %v4779_v1 = vadd.f32 %v1561_v0, %v1448_v63  ;;  %v1450_v2 = vpop.f32.mrf.mxu0 }
 0x153   :  { %v1563_v3 = vpop.f32.mrf.mxu1 }
 0x154   :  { %v4781_v4 = vadd.f32 %v1563_v3, %v1450_v2  ;;  %v4783_v5 = vpop.f32.mrf.mxu0 }
 0x155   :  { %v4785_v6 = vpop.f32.mrf.mxu1 }
 0x156   :  { %v4787_v7 = vpop.f32.mrf.mxu0 }
 0x157   :  { %v4789_v9 = vpop.f32.mrf.mxu1 }
 0x158   :  { %v1458_v10 = vpop.f32.mrf.mxu0 }
 0x159   :  { %v1571_v11 = vpop.f32.mrf.mxu1 }
 0x15a   :  { %v4791_v12 = vadd.f32 %v1571_v11, %v1458_v10  ;;  %v1460_v13 = vpop.f32.mrf.mxu0 }
 0x15b   :  { %v1573_v15 = vpop.f32.mrf.mxu1 }
 0x15c   :  { %v4793_v17 = vadd.f32 %v1573_v15, %v1460_v13  ;;  %v4795_v18 = vpop.f32.mrf.mxu0 }
 0x15d   :  { %v4797_v21 = vpop.f32.mrf.mxu1 }
 0x15e   :  { %5553 = vst [vmem:[#allocation16_spill] sm:$0xff] %v4797_v21  ;;  %v4799_v22 = vpop.f32.mrf.mxu0 }
 0x15f   :  { %5554 = vst [vmem:[#allocation17_spill] sm:$0xff] %v4799_v22  ;;  %v4801_v23 = vpop.f32.mrf.mxu1 }
 0x160   :  { %5555 = vst [vmem:[#allocation18_spill] sm:$0xff] %v4801_v23  ;;  %v1468_v24 = vpop.f32.mrf.mxu0 }
 0x161   :  { %v1581_v25 = vpop.f32.mrf.mxu1 }
 0x162   :  { %v4803_v28 = vadd.f32 %v1581_v25, %v1468_v24  ;;  %v1470_v29 = vpop.f32.mrf.mxu0 }
 0x163   :  { %v1583_v30 = vpop.f32.mrf.mxu1 }
 0x164   :  { %v4805_v31 = vadd.f32 %v1583_v30, %v1470_v29  ;;  %v4807_v32 = vpop.f32.mrf.mxu0 }
 0x165   :  { %5556 = vst [vmem:[#allocation19_spill] sm:$0xff] %v4807_v32  ;;  %v4809_v33 = vpop.f32.mrf.mxu1 }
 0x166   :  { %5557 = vst [vmem:[#allocation20_spill] sm:$0xff] %v4809_v33  ;;  %v4811_v34 = vpop.f32.mrf.mxu0 }
 0x167   :  { %5558 = vst [vmem:[#allocation21_spill] sm:$0xff] %v4811_v34  ;;  %v4813_v36 = vpop.f32.mrf.mxu1 }
 0x168   :  { %5559 = vst [vmem:[#allocation22_spill] sm:$0xff] %v4813_v36  ;;  %v1478_v37 = vpop.f32.mrf.mxu0 }
 0x169   :  { %v1591_v38 = vpop.f32.mrf.mxu1 }
 0x16a   :  { %v4815_v39 = vadd.f32 %v1591_v38, %v1478_v37  ;;  %v1480_v40 = vpop.f32.mrf.mxu0 }
 0x16b   :  { %v1593_v44 = vpop.f32.mrf.mxu1 }
 0x16c   :  { %v4817_v47 = vadd.f32 %v1593_v44, %v1480_v40  ;;  %v4819_v48 = vpop.f32.mrf.mxu0 }
 0x16d   :  { %5560 = vst [vmem:[#allocation23_spill] sm:$0xff] %v4819_v48  ;;  %v4821_v53 = vpop.f32.mrf.mxu1 }
 0x16e   :  { %5561 = vst [vmem:[#allocation24_spill] sm:$0xff] %v4821_v53  ;;  %v4823_v54 = vpop.f32.mrf.mxu0 }
 0x16f   :  { %5562 = vst [vmem:[#allocation25_spill] sm:$0xff] %v4823_v54  ;;  %v4825_v56 = vpop.f32.mrf.mxu1 }
 0x170   :  { %5563 = vst [vmem:[#allocation26_spill] sm:$0xff] %v4825_v56  ;;  %v1488_v57 = vpop.f32.mrf.mxu0 }
 0x171   :  { %v1601_v63 = vpop.f32.mrf.mxu1 }
 0x172   :  { %v4827_v0 = vadd.f32 %v1601_v63, %v1488_v57  ;;  %v1490_v2 = vpop.f32.mrf.mxu0 }
 0x173   :  { %v1603_v3 = vpop.f32.mrf.mxu1 }
 0x174   :  { %v4829_v10 = vadd.f32 %v1603_v3, %v1490_v2  ;;  %v4831_v11 = vpop.f32.mrf.mxu0 }
 0x175   :  { %5564 = vst [vmem:[#allocation27_spill] sm:$0xff] %v4831_v11  ;;  %v4833_v13 = vpop.f32.mrf.mxu1 }
 0x176   :  { %5565 = vst [vmem:[#allocation28_spill] sm:$0xff] %v4833_v13  ;;  %v4835_v15 = vpop.f32.mrf.mxu0 }
 0x177   :  { %5566 = vst [vmem:[#allocation29_spill] sm:$0xff] %v4835_v15  ;;  %v4837_v24 = vpop.f32.mrf.mxu1 }
 0x178   :  { %5567 = vst [vmem:[#allocation30_spill] sm:$0xff] %v4837_v24  ;;  %v1644_v25 = vpop.f32.mrf.mxu0 }
 0x179   :  { %v4839_v29 = vpop.f32.mrf.mxu1  ;;  %v4842_v30 = vadd.f32 %v1644_v25, %v4730_v8 }
 0x17a   :  { %v1646_v37 = vpop.f32.mrf.mxu0 }
 0x17b   :  { %v4844_v38 = vpop.f32.mrf.mxu1  ;;  %v4847_v40 = vadd.f32 %v1646_v37, %v4732_v14 }
 0x17c   :  { %v1648_v44 = vpop.f32.mrf.mxu0 }
 0x17d   :  { %v4851_v63 = vpop.f32.mrf.mxu1 }
 0x17e   :  { %v4849_v57 = vpop.f32.mrf.mxu0 }
 0x17f   :  { %v4856_v49 = vpop.f32.mrf.mxu1 }
 0x180   :  { %v1654_v2 = vpop.f32.mrf.mxu0 }
 0x181   :  { %v4854_v3 = vadd.f32 %v1654_v2, %v4742_v35  ;;  %v4863_v24 = vpop.f32.mrf.mxu1 }
 0x182   :  { %v1656_v50 = vpop.f32.mrf.mxu0 }
 0x183   :  { %v4859_v8 = vadd.f32 %v1656_v50, %v4744_v41  ;;  %v4870_v13 = vpop.f32.mrf.mxu1 }
 0x184   :  { %v4861_v25 = vpop.f32.mrf.mxu0 }
 0x185   :  { %v4877_v41 = vpop.f32.mrf.mxu1 }
 0x186   :  { %v4865_v14 = vpop.f32.mrf.mxu0 }
 0x187   :  { %v4884_v53 = vpop.f32.mrf.mxu1 }
 0x188   :  { %v1664_v37 = vpop.f32.mrf.mxu0 }
 0x189   :  { %v4868_v15 = vadd.f32 %v1664_v37, %v4767_v55 }
 0x18a   :  { %v1666_v35 = vpop.f32.mrf.mxu0 }
 0x18b   :  { %v4873_v2 = vadd.f32 %v1666_v35, %v4769_v58  ;;  %v4891_v58 = vpop.f32.mrf.mxu1 }
 0x18c   :  { %v4875_v11 = vpop.f32.mrf.mxu0 }
 0x18d   :  { %v4898_v33 = vpop.f32.mrf.mxu1 }
 0x18e   :  { %v4879_v50 = vpop.f32.mrf.mxu0 }
 0x190   :  { %v1674_v56 = vpop.f32.mrf.mxu0 }
 0x191   :  { %v4882_v54 = vadd.f32 %v1674_v56, %v4779_v1 }
 0x192   :  { %v1676_v55 = vpop.f32.mrf.mxu0 }
 0x193   :  { %v4887_v37 = vadd.f32 %v1676_v55, %v4781_v4  ;;  %v4905_v4 = vpop.f32.mrf.mxu1 }
 0x194   :  { %v4889_v48 = vpop.f32.mrf.mxu0 }
 0x195   :  { %v4912_v21 = vpop.f32.mrf.mxu1 }
 0x196   :  { %v4893_v35 = vpop.f32.mrf.mxu0 }
 0x198   :  { %v1684_v36 = vpop.f32.mrf.mxu0 }
 0x199   :  { %v4896_v34 = vadd.f32 %v1684_v36, %v4791_v12 }
 0x19a   :  { %v1686_v1 = vpop.f32.mrf.mxu0 }
 0x19b   :  { %5568 = vst [vmem:[#allocation31_spill] sm:$0xff] %v4896_v34  ;;  %v4901_v56 = vadd.f32 %v1686_v1, %v4793_v17  ;;  %v4919_v17 = vpop.f32.mrf.mxu1 }
 0x19c   :  { %v4903_v32 = vpop.f32.mrf.mxu0 }
 0x19d   :  { %5569 = vst [vmem:[#allocation32_spill] sm:$0xff] %v4901_v56  ;;  %5570 = vst [vmem:[#allocation33_spill] sm:$0xff] %v4903_v32 }
 0x19e   :  { %v4907_v55 = vpop.f32.mrf.mxu0 }
 0x19f   :  { %5571 = vst [vmem:[#allocation34_spill] sm:$0xff] %v4907_v55  ;;  %v4926_v55 = vpop.f32.mrf.mxu1 }
 0x1a0   :  { %v1694_v23 = vpop.f32.mrf.mxu0 }
 0x1a1   :  { %v4910_v22 = vadd.f32 %v1694_v23, %v4803_v28 }
 0x1a2   :  { %v1696_v12 = vpop.f32.mrf.mxu0 }
 0x1a3   :  { %5572 = vst [vmem:[#allocation35_spill] sm:$0xff] %v4910_v22  ;;  %v4915_v36 = vadd.f32 %v1696_v12, %v4805_v31  ;;  %v4933_v31 = vpop.f32.mrf.mxu1 }
 0x1a4   :  { %v4917_v34 = vpop.f32.mrf.mxu0 }
 0x1a5   :  { %5573 = vst [vmem:[#allocation36_spill] sm:$0xff] %v4915_v36  ;;  %5574 = vst [vmem:[#allocation37_spill] sm:$0xff] %v4917_v34 }
 0x1a6   :  { %v4921_v1 = vpop.f32.mrf.mxu0 }
 0x1a7   :  { %5575 = vst [vmem:[#allocation38_spill] sm:$0xff] %v4921_v1  ;;  %v4940_v1 = vpop.f32.mrf.mxu1 }
 0x1a8   :  { %v1704_v56 = vpop.f32.mrf.mxu0 }
 0x1a9   :  { %v4924_v32 = vadd.f32 %v1704_v56, %v4815_v39 }
 0x1aa   :  { %v1706_v23 = vpop.f32.mrf.mxu0 }
 0x1ab   :  { %5576 = vst [vmem:[#allocation39_spill] sm:$0xff] %v4924_v32  ;;  %v4929_v28 = vadd.f32 %v1706_v23, %v4817_v47  ;;  %v1536_v47 = vadd.f32 %v4736_v20, %v4734_v19  ;;  %v4949_v23 = vpop.f32.mrf.mxu1  ;;  %v1760_v19 = vadd.f32 %v4844_v38, %v4847_v40 }
 0x1ac   :  { %v4931_v22 = vpop.f32.mrf.mxu0 }
 0x1ad   :  { %5577 = vst [vmem:[#allocation40_spill] sm:$0xff] %v4929_v28 }
 0x1ae   :  { %v4935_v12 = vpop.f32.mrf.mxu0 }
 0x1af   :  { %5578 = vst [vmem:[#allocation41_spill] sm:$0xff] %v4935_v12  ;;  %v1538_v12 = vadd.f32 %v4740_v27, %v4738_v26  ;;  %v1546_v26 = vadd.f32 %v4752_v46, %v4750_v45  ;;  %v2047_v45 = vld [vmem:[#allocation7 + $0x190] sm:$0xff] }
 0x1b0   :  { %v1714_v36 = vpop.f32.mrf.mxu0 }
 0x1b1   :  { %v4938_v34 = vadd.f32 %v1714_v36, %v4827_v0  ;;  %v1649_v0 = vadd.f32 %v1648_v44, %v1536_v47 }
 0x1b2   :  { %v1716_v39 = vpop.f32.mrf.mxu0 }
 0x1b3   :  { %5579 = vst [vmem:[#allocation42_spill] sm:$0xff] %v4938_v34  ;;  %v4943_v56 = vadd.f32 %v1716_v39, %v4829_v10  ;;  %v1758_v34 = vadd.f32 %v4839_v29, %v4842_v30  ;;  %v1651_v10 = vadd.f32 %v4849_v57, %v1538_v12  ;;  %v4958_v39 = vpop.f32.mrf.mxu1  ;;  %v1762_v20 = vadd.f32 %v4851_v63, %v1649_v0 }
 0x1b4   :  { %v4945_v32 = vpop.f32.mrf.mxu0  ;;  %v1548_v29 = vadd.f32 %v4764_v52, %v4762_v51  ;;  %v1659_v12 = vadd.f32 %v4861_v25, %v1546_v26  ;;  %v2051_v51 = vld [vmem:[#allocation7 + $0x1b0] sm:$0xff]  ;;  %v2048_v52 = vld [vmem:[#allocation7 + $0x198] sm:$0xff] }
 0x1b5   :  { %5580 = vst [vmem:[#allocation43_spill] sm:$0xff] %v4943_v56  ;;  %5581 = vst [vmem:[#allocation44_spill] sm:$0xff] %v4945_v32  ;;  %v1764_v27 = vadd.f32 %v4856_v49, %v1651_v10  ;;  %v4968_v30 = vpop.f32.mrf.mxu1  ;;  %v3995_v26 = vcombine.high %v2047_v45, %v2051_v51 }
 0x1b6   :  { %v4951_v28 = vpop.f32.mrf.mxu0  ;;  %v1661_v46 = vadd.f32 %v4865_v14, %v1548_v29  ;;  %v1556_v14 = vadd.f32 %v4773_v60, %v4771_v59  ;;  %v1558_v59 = vadd.f32 %v4777_v62, %v4775_v61  ;;  %v1778_v61 = vadd.f32 %v4891_v58, %v4868_v15  ;;  %v2032_v15 = vld [vmem:[#allocation7 + $0x118] sm:$0xff] }
 0x1b7   :  { %5582 = vst [vmem:[#allocation45_spill] sm:$0xff] %v4951_v28  ;;  %v4976_v10 = vpop.f32.mrf.mxu1  ;;  %v2036_v58 = vld [vmem:[#allocation7 + $0x138] sm:$0xff] }
 0x1b8   :  { %v1870_v36 = vpop.f32.mrf.mxu0 }
 0x1b9   :  { %v1871_v32 = vadd.f32 %v1870_v36, %v1758_v34  ;;  %v1768_v34 = vadd.f32 %v4863_v24, %v4854_v3  ;;  %v2052_v36 = vld [vmem:[#allocation7 + $0x1b8] sm:$0xff]  ;;  %v4996_v60 = vpop.f32.mrf.mxu1 }
 0x1ba   :  { %v1872_v56 = vpop.f32.mrf.mxu0 }
 0x1bb   :  { %v1873_v44 = vadd.f32 %v1872_v56, %v1760_v19  ;;  %v1949_v38 = vmax.f32 %v1871_v32, 0.0  ;;  %v1770_v32 = vadd.f32 %v4870_v13, %v4859_v8  ;;  %v1772_v19 = vadd.f32 %v4877_v41, %v1659_v12  ;;  %v4992_v13 = vld [vmem:[#allocation7 + $0x170] sm:$0xff]  ;;  %v2040_v8 = vld [vmem:[#allocation7 + $0x158] sm:$0xff] }
 0x1bc   :  { %v1874_v28 = vpop.f32.mrf.mxu0  ;;  %v2044_v41 = vld [vmem:[#allocation7 + $0x178] sm:$0xff] }
 0x1bd   :  { %v1875_v47 = vadd.f32 %v1874_v28, %v1762_v20  ;;  %v1950_v49 = vmax.f32 %v1873_v44, 0.0  ;;  %v4987_v44 = vld [vmem:[#allocation7 + $0x150] sm:$0xff] }
 0x1be   :  { %v1876_v57 = vpop.f32.mrf.mxu0 }
 0x1bf   :  { %v1951_v40 = vmax.f32 %v1875_v47, 0.0  ;;  %v1877_v63 = vadd.f32 %v1876_v57, %v1764_v27  ;;  %v4985_v27 = vcombine.high %v2048_v52, %v2052_v36  ;;  %v1774_v47 = vadd.f32 %v4884_v53, %v1661_v46 }
 0x1c0   :  { %v1880_v0 = vpop.f32.mrf.mxu0  ;;  %v3994_v53 = vcombine.low %v2047_v45, %v2051_v51  ;;  %v5583_v46 = vcombine.low %v4746_v42, %v4748_v43  ;;  %v3987_v45 = vcombine.high %v4987_v44, %v4992_v13 }
 0x1c1   :  { %v4974_v28 = vpack.c.bf16 %v1951_v40, %v1949_v38  ;;  %v1952_v56 = vmax.f32 %v1877_v63, 0.0  ;;  %v1881_v3 = vadd.f32 %v1880_v0, %v1768_v34  ;;  %v5000_v38 = vcombine.low %v2048_v52, %v2052_v36  ;;  %v5019_v52 = vld [vmem:[#allocation7 + $0x130] sm:$0xff] }
 0x1c2   :  { %v1882_v25 = vpop.f32.mrf.mxu0  ;;  %v1669_v40 = vadd.f32 %v4875_v11, %v1556_v14  ;;  %v5012_v11 = vcombine.high %v2040_v8, %v2044_v41  ;;  %v1780_v36 = vadd.f32 %v4898_v33, %v4873_v2 }
 0x1c3   :  { %v4981_v24 = vpack.c.bf16 %v1952_v56, %v1950_v49  ;;  %v1883_v29 = vadd.f32 %v1882_v25, %v1770_v32  ;;  %v1953_v63 = vmax.f32 %v1881_v3, 0.0  ;;  %v5014_v49 = vld [vmem:[#allocation7 + $0x110] sm:$0xff]  ;;  %v1671_v56 = vadd.f32 %v4879_v50, %v1558_v59  ;;  %v5023_v25 = vpop.f32.mrf.mxu1 }
 0x1c4   :  { %v1884_v20 = vpop.f32.mrf.mxu0  ;;  %v5027_v3 = vcombine.low %v2040_v8, %v2044_v41  ;;  %v1782_v50 = vadd.f32 %v4905_v4, %v1669_v40  ;;  %v3979_v2 = vcombine.high %v5014_v49, %v5019_v52  ;;  %v1568_v8 = vadd.f32 %v4789_v9, %v4787_v7 }
 0x1c5   :  { %v1885_v57 = vadd.f32 %v1884_v20, %v1772_v19  ;;  %2839 = vmatprep.mubr.bf16.mxu1 %v4981_v24  ;;  %2952 = vmatprep.mubr.bf16.mxu0 %v4981_v24  ;;  %v1954_v42 = vmax.f32 %v1883_v29, 0.0  ;;  %v3986_v19 = vcombine.low %v4987_v44, %v4992_v13  ;;  %v5038_v44 = vcombine.high %v2032_v15, %v2036_v58  ;;  %v2028_v13 = vld [vmem:[#allocation7 + $0xf8] sm:$0xff]  ;;  %v5049_v41 = vpop.f32.mrf.mxu1 }
 0x1c6   :  { %v1886_v12 = vpop.f32.mrf.mxu0  ;;  %2840 = vmatmul.mubr.bf16.vlgmr.msra.gmra.mxu1 %v4974_v28  ;;  %2953 = vmatmul.mubr.bf16.vlgmr.msra.gmra.mxu0 %v4974_v28  ;;  %v1784_v4 = vadd.f32 %v4912_v21, %v1671_v56  ;;  %v3978_v21 = vcombine.low %v5014_v49, %v5019_v52  ;;  %v1788_v7 = vadd.f32 %v4919_v17, %v4882_v54  ;;  %v5071_v56 = vld [vmem:[#allocation7 + $0xb0] sm:$0xff]  ;;  %v2016_v54 = vld [vmem:[#allocation7 + $0x98] sm:$0xff] }
 0x1c7   :  { %v1955_v34 = vmax.f32 %v1885_v57, 0.0  ;;  %v1887_v0 = vadd.f32 %v1886_v12, %v1774_v47  ;;  %3034 = vmatpush1.bf16.msra.mxu1 %v5583_v46  ;;  %3147 = vmatpush1.bf16.msra.mxu0 %v4758_v16  ;;  %v5040_v47 = vld [vmem:[#allocation7 + $0xd0] sm:$0xff]  ;;  %v5055_v12 = vcombine.low %v2032_v15, %v2036_v58  ;;  %v2020_v17 = vld [vmem:[#allocation7 + $0xb8] sm:$0xff] }
 0x1c8   :  { %v1890_v62 = vpop.f32.mrf.mxu0  ;;  %3035 = vmatprep.subr.bf16.mxu1 %v3995_v26  ;;  %3148 = vmatprep.subr.bf16.mxu0 %v4985_v27  ;;  %v1566_v26 = vadd.f32 %v4785_v6, %v4783_v5  ;;  %v5045_v5 = vld [vmem:[#allocation7 + $0xf0] sm:$0xff]  ;;  %v2024_v6 = vld [vmem:[#allocation7 + $0xd8] sm:$0xff] }
 0x1c9   :  { %v5017_v43 = vpack.c.bf16 %v1955_v34, %v1953_v63  ;;  %v1956_v51 = vmax.f32 %v1887_v0, 0.0  ;;  %v1891_v20 = vadd.f32 %v1890_v62, %v1778_v61  ;;  %v3971_v0 = vcombine.high %v5040_v47, %v5045_v5  ;;  %v5066_v61 = vld [vmem:[#allocation7 + $0x90] sm:$0xff] }
 0x1ca   :  { %v1892_v32 = vpop.f32.mrf.mxu0  ;;  %v5064_v46 = vcombine.high %v2024_v6, %v2028_v13  ;;  %v3970_v15 = vcombine.low %v5040_v47, %v5045_v5  ;;  %v5079_v58 = vcombine.low %v2024_v6, %v2028_v13  ;;  %v2008_v47 = vld [vmem:[#allocation7 + $0x58] sm:$0xff] }
 0x1cb   :  { %v5030_v14 = vpack.c.bf16 %v1956_v51, %v1954_v42  ;;  %3036 = vmatpush1.bf16.msra.mxu1 %v3994_v53  ;;  %3149 = vmatpush1.bf16.msra.mxu0 %v5000_v38  ;;  %v1893_v29 = vadd.f32 %v1892_v32, %v1780_v36  ;;  %v1679_v53 = vadd.f32 %v4889_v48, %v1566_v26  ;;  %v1957_v40 = vmax.f32 %v1891_v20, 0.0  ;;  %v5075_v51 = vpop.f32.mrf.mxu1  ;;  %v5092_v26 = vld [vmem:[#allocation7 + $0x50] sm:$0xff] }
 0x1cc   :  { %v1894_v33 = vpop.f32.mrf.mxu0  ;;  %3037 = vmatprep.subr.bf16.mxu1 %v3987_v45  ;;  %3150 = vmatprep.subr.bf16.mxu0 %v5012_v11  ;;  %v1681_v48 = vadd.f32 %v4893_v35, %v1568_v8  ;;  %v1790_v42 = vadd.f32 %v4926_v55, %v4887_v37  ;;  %v3963_v55 = vcombine.high %v5066_v61, %v5071_v56 }
 0x1cd   :  { %v1895_v57 = vadd.f32 %v1894_v33, %v1782_v50  ;;  %2849 = vmatprep.mubr.bf16.mxu1 %v5030_v14  ;;  %2962 = vmatprep.mubr.bf16.mxu0 %v5030_v14  ;;  %v1958_v62 = vmax.f32 %v1893_v29, 0.0  ;;  %v1792_v35 = vadd.f32 %v4933_v31, %v1679_v53  ;;  %v5090_v20 = vcombine.high %v2016_v54, %v2020_v17  ;;  %v5585_v29 = vld [vmem:[#allocation17_spill] sm:$0xff]  ;;  %v5101_v6 = vpop.f32.mrf.mxu1 }
 0x1ce   :  { %v1896_v59 = vpop.f32.mrf.mxu0  ;;  %2850 = vmatmul.mubr.bf16.gmra.mxu1 %v5017_v43  ;;  %2963 = vmatmul.mubr.bf16.gmra.mxu0 %v5017_v43  ;;  %v1794_v31 = vadd.f32 %v4940_v1, %v1681_v48  ;;  %v3962_v1 = vcombine.low %v5066_v61, %v5071_v56  ;;  %v5107_v8 = vcombine.low %v2016_v54, %v2020_v17  ;;  %v5118_v48 = vld [vmem:[#allocation7 + $0x10] sm:$0xff] }
 0x1cf   :  { %v1959_v63 = vmax.f32 %v1895_v57, 0.0  ;;  %v1897_v34 = vadd.f32 %v1896_v59, %v1784_v4  ;;  %3038 = vmatpush1.bf16.msra.mxu1 %v3986_v19  ;;  %3151 = vmatpush1.bf16.msra.mxu0 %v5027_v3  ;;  %v5584_v19 = vld [vmem:[#allocation16_spill] sm:$0xff]  ;;  %v2012_v4 = vld [vmem:[#allocation7 + $0x78] sm:$0xff]  ;;  %v5586_v57 = vld [vmem:[#allocation18_spill] sm:$0xff] }
 0x1d0   :  { %v1900_v9 = vpop.f32.mrf.mxu0  ;;  %3039 = vmatprep.subr.bf16.mxu1 %v3979_v2  ;;  %3152 = vmatprep.subr.bf16.mxu0 %v5038_v44  ;;  %v1576_v50 = vadd.f32 %v5584_v19, %v4795_v18  ;;  %v5097_v18 = vld [vmem:[#allocation7 + $0x70] sm:$0xff]  ;;  %v1578_v5 = vadd.f32 %v5586_v57, %v5585_v29  ;;  %v5587_v59 = vld [vmem:[#allocation33_spill] sm:$0xff]  ;;  %v5116_v61 = vcombine.high %v2008_v47, %v2012_v4 }
 0x1d1   :  { %v5069_v45 = vpack.c.bf16 %v1959_v63, %v1957_v40  ;;  %v1960_v49 = vmax.f32 %v1897_v34, 0.0  ;;  %v1901_v32 = vadd.f32 %v1900_v9, %v1788_v7  ;;  %v5588_v34 = vld [vmem:[#allocation31_spill] sm:$0xff]  ;;  %v5592_v29 = vld [vmem:[#allocation20_spill] sm:$0xff] }
 0x1d2   :  { %v1902_v52 = vpop.f32.mrf.mxu0  ;;  %v1798_v7 = vadd.f32 %v4949_v23, %v5588_v34  ;;  %v2000_v23 = vld [vmem:[#allocation7 + $0x18] sm:$0xff] }
 0x1d3   :  { %v5082_v36 = vpack.c.bf16 %v1960_v49, %v1958_v62  ;;  %3040 = vmatpush1.bf16.msra.mxu1 %v3978_v21  ;;  %3153 = vmatpush1.bf16.msra.mxu0 %v5055_v12  ;;  %v1903_v33 = vadd.f32 %v1902_v52, %v1790_v42  ;;  %v1689_v21 = vadd.f32 %v5587_v59, %v1576_v50  ;;  %v1961_v53 = vmax.f32 %v1901_v32, 0.0  ;;  %v5589_v62 = vld [vmem:[#allocation34_spill] sm:$0xff]  ;;  %v5123_v42 = vld [vmem:[#allocation7 + $0x30] sm:$0xff]  ;;  %v2004_v52 = vld [vmem:[#allocation7 + $0x38] sm:$0xff]  ;;  %v5127_v32 = vpop.f32.mrf.mxu1 }
 0x1d4   :  { %v1904_v37 = vpop.f32.mrf.mxu0  ;;  %3041 = vmatprep.subr.bf16.mxu1 %v3971_v0  ;;  %3154 = vmatprep.subr.bf16.mxu0 %v5064_v46  ;;  %v3955_v0 = vcombine.high %v5092_v26, %v5097_v18  ;;  %v1691_v49 = vadd.f32 %v5589_v62, %v1578_v5  ;;  %v3954_v50 = vcombine.low %v5092_v26, %v5097_v18  ;;  %v2124_v59 = vld [vmem:[#allocation7 + $0x3f8] sm:$0xff] }
 0x1d5   :  { %v1905_v2 = vadd.f32 %v1904_v37, %v1792_v35  ;;  %2859 = vmatprep.mubr.bf16.mxu1 %v5082_v36  ;;  %2972 = vmatprep.mubr.bf16.mxu0 %v5082_v36  ;;  %v1962_v56 = vmax.f32 %v1903_v33, 0.0  ;;  %v5131_v37 = vcombine.low %v2008_v47, %v2012_v4  ;;  %v3947_v26 = vcombine.high %v5118_v48, %v5123_v42  ;;  %v5144_v47 = vld [vmem:[#allocation7 + $0x3d0] sm:$0xff] }
 0x1d6   :  { %v1906_v13 = vpop.f32.mrf.mxu0  ;;  %2860 = vmatmul.mubr.bf16.gmra.mxu1 %v5069_v45  ;;  %2973 = vmatmul.mubr.bf16.gmra.mxu0 %v5069_v45  ;;  %v5142_v18 = vcombine.high %v2000_v23, %v2004_v52 }
 0x1d7   :  { %v1963_v40 = vmax.f32 %v1905_v2, 0.0  ;;  %v1907_v63 = vadd.f32 %v1906_v13, %v1794_v31  ;;  %3042 = vmatpush1.bf16.msra.mxu1 %v3970_v15  ;;  %3155 = vmatpush1.bf16.msra.mxu0 %v5079_v58  ;;  %v5590_v15 = vld [vmem:[#allocation32_spill] sm:$0xff]  ;;  %v5591_v2 = vld [vmem:[#allocation19_spill] sm:$0xff] }
 0x1d8   :  { %v1910_v9 = vpop.f32.mrf.mxu0  ;;  %3043 = vmatprep.subr.bf16.mxu1 %v3963_v55  ;;  %3156 = vmatprep.subr.bf16.mxu0 %v5090_v20  ;;  %v1800_v35 = vadd.f32 %v4958_v39, %v5590_v15  ;;  %v1802_v55 = vadd.f32 %v4968_v30, %v1689_v21  ;;  %v1586_v57 = vadd.f32 %v5592_v29, %v5591_v2  ;;  %v5149_v13 = vld [vmem:[#allocation7 + $0x3f0] sm:$0xff]  ;;  %v5593_v21 = vld [vmem:[#allocation21_spill] sm:$0xff] }
 0x1d9   :  { %v5121_v54 = vpack.c.bf16 %v1963_v40, %v1961_v53  ;;  %v1964_v17 = vmax.f32 %v1907_v63, 0.0  ;;  %v1911_v33 = vadd.f32 %v1910_v9, %v1798_v7  ;;  %v1804_v30 = vadd.f32 %v4976_v10, %v1691_v49  ;;  %v5594_v53 = vld [vmem:[#allocation22_spill] sm:$0xff]  ;;  %v5153_v63 = vpop.f32.mrf.mxu1  ;;  %v5595_v9 = vld [vmem:[#allocation37_spill] sm:$0xff]  ;;  %v5175_v2 = vld [vmem:[#allocation7 + $0x3b0] sm:$0xff] }
 0x1da   :  { %v1912_v19 = vpop.f32.mrf.mxu0  ;;  %v1588_v40 = vadd.f32 %v5594_v53, %v5593_v21  ;;  %v3946_v10 = vcombine.low %v5118_v48, %v5123_v42  ;;  %v5159_v7 = vcombine.low %v2000_v23, %v2004_v52  ;;  %v4067_v48 = vcombine.high %v5144_v47, %v5149_v13  ;;  %v5170_v23 = vld [vmem:[#allocation7 + $0x390] sm:$0xff]  ;;  %v5597_v52 = vld [vmem:[#allocation38_spill] sm:$0xff]  ;;  %v2116_v29 = vld [vmem:[#allocation7 + $0x3b8] sm:$0xff] }
 0x1db   :  { %v5134_v31 = vpack.c.bf16 %v1964_v17, %v1962_v56  ;;  %3044 = vmatpush1.bf16.msra.mxu1 %v3962_v1  ;;  %3157 = vmatpush1.bf16.msra.mxu0 %v5107_v8  ;;  %v1913_v4 = vadd.f32 %v1912_v19, %v1800_v35  ;;  %v2120_v1 = vld [vmem:[#allocation7 + $0x3d8] sm:$0xff]  ;;  %v1965_v62 = vmax.f32 %v1911_v33, 0.0  ;;  %v5596_v17 = vld [vmem:[#allocation35_spill] sm:$0xff] }
 0x1dc   :  { %v1914_v39 = vpop.f32.mrf.mxu0  ;;  %3045 = vmatprep.subr.bf16.mxu1 %v3955_v0  ;;  %3158 = vmatprep.subr.bf16.mxu0 %v5116_v61  ;;  %v1699_v0 = vadd.f32 %v5595_v9, %v1586_v57  ;;  %v1808_v15 = vadd.f32 %v4996_v60, %v5596_v17  ;;  %v5168_v42 = vcombine.high %v2120_v1, %v2124_v59  ;;  %v2112_v60 = vld [vmem:[#allocation7 + $0x398] sm:$0xff]  ;;  %v5598_v57 = vld [vmem:[#allocation36_spill] sm:$0xff] }
 0x1dd   :  { %v1915_v5 = vadd.f32 %v1914_v39, %v1802_v55  ;;  %2869 = vmatprep.mubr.bf16.mxu1 %v5134_v31  ;;  %2982 = vmatprep.mubr.bf16.mxu0 %v5134_v31  ;;  %v1701_v19 = vadd.f32 %v5597_v52, %v1588_v40  ;;  %v1966_v55 = vmax.f32 %v1913_v4, 0.0  ;;  %v1810_v39 = vadd.f32 %v5023_v25, %v5598_v57  ;;  %v5600_v9 = vld [vmem:[#allocation24_spill] sm:$0xff]  ;;  %v5602_v17 = vld [vmem:[#allocation25_spill] sm:$0xff] }
 0x1de   :  { %v1916_v34 = vpop.f32.mrf.mxu0  ;;  %2870 = vmatmul.mubr.bf16.gmra.mxu1 %v5121_v54  ;;  %2983 = vmatmul.mubr.bf16.gmra.mxu0 %v5121_v54  ;;  %v5183_v21 = vcombine.low %v2120_v1, %v2124_v59  ;;  %v1812_v4 = vadd.f32 %v5049_v41, %v1699_v0  ;;  %v5196_v1 = vld [vmem:[#allocation7 + $0x350] sm:$0xff] }
 0x1df   :  { %v1967_v49 = vmax.f32 %v1915_v5, 0.0  ;;  %v1917_v56 = vadd.f32 %v1916_v34, %v1804_v30  ;;  %3046 = vmatpush1.bf16.msra.mxu1 %v3954_v50  ;;  %3159 = vmatpush1.bf16.msra.mxu0 %v5131_v37  ;;  %v4066_v5 = vcombine.low %v5144_v47, %v5149_v13  ;;  %v5599_v34 = vld [vmem:[#allocation23_spill] sm:$0xff]  ;;  %v4059_v47 = vcombine.high %v5170_v23, %v5175_v2  ;;  %v5201_v0 = vld [vmem:[#allocation7 + $0x370] sm:$0xff] }
 0x1e0   :  { %v1920_v35 = vpop.f32.mrf.mxu0  ;;  %3047 = vmatprep.subr.bf16.mxu1 %v3947_v26  ;;  %3160 = vmatprep.subr.bf16.mxu0 %v5142_v18  ;;  %v5179_v26 = vpop.f32.mrf.mxu1  ;;  %v5194_v13 = vcombine.high %v2112_v60, %v2116_v29  ;;  %v1814_v41 = vadd.f32 %v5075_v51, %v1701_v19  ;;  %v4058_v51 = vcombine.low %v5170_v23, %v5175_v2 }
 0x1e1   :  { %v5173_v50 = vpack.c.bf16 %v1967_v49, %v1965_v62  ;;  %v1968_v33 = vmax.f32 %v1917_v56, 0.0  ;;  %v1921_v40 = vadd.f32 %v1920_v35, %v1808_v15  ;;  %v1596_v62 = vadd.f32 %v5600_v9, %v5599_v34  ;;  %v2104_v49 = vld [vmem:[#allocation7 + $0x358] sm:$0xff]  ;;  %v5603_v15 = vld [vmem:[#allocation26_spill] sm:$0xff] }
 0x1e2   :  { %v1922_v30 = vpop.f32.mrf.mxu0  ;;  %5601 = vst [vmem:[#allocation16_spill] sm:$0xff] %v5194_v13  ;;  %v2108_v56 = vld [vmem:[#allocation7 + $0x378] sm:$0xff]  ;;  %v1598_v35 = vadd.f32 %v5603_v15, %v5602_v17  ;;  %v5211_v19 = vcombine.low %v2112_v60, %v2116_v29  ;;  %v4051_v23 = vcombine.high %v5196_v1, %v5201_v0  ;;  %v5222_v60 = vld [vmem:[#allocation7 + $0x310] sm:$0xff]  ;;  %v4050_v15 = vcombine.low %v5196_v1, %v5201_v0 }
 0x1e3   :  { %v5186_v53 = vpack.c.bf16 %v1968_v33, %v1966_v55  ;;  %3048 = vmatpush1.bf16.msra.mxu1 %v3946_v10  ;;  %3161 = vmatpush1.bf16.msra.mxu0 %v5159_v7  ;;  %v1923_v59 = vadd.f32 %v1922_v30, %v1810_v39  ;;  %v1709_v55 = vadd.f32 %v4931_v22, %v1596_v62  ;;  %v1969_v33 = vmax.f32 %v1921_v40, 0.0  ;;  %v5605_v30 = vld [vmem:[#allocation39_spill] sm:$0xff]  ;;  %v5607_v22 = vld [vmem:[#allocation41_spill] sm:$0xff]  ;;  %v5227_v62 = vld [vmem:[#allocation7 + $0x330] sm:$0xff] }
 0x1e4   :  { %v1924_v25 = vpop.f32.mrf.mxu0  ;;  %3049 = vmatprep.subr.bf16.mxu1 %v4067_v48  ;;  %3162 = vmatprep.subr.bf16.mxu0 %v5168_v42  ;;  %v5205_v48 = vpop.f32.mrf.mxu1  ;;  %5604 = vst [vmem:[#allocation17_spill] sm:$0xff] %v5211_v19  ;;  %v5220_v2 = vcombine.high %v2104_v49, %v2108_v56  ;;  %v1711_v29 = vadd.f32 %v5607_v22, %v1598_v35  ;;  %v5246_v0 = vld [vmem:[#allocation7 + $0x2d0] sm:$0xff] }
 0x1e5   :  { %v1925_v10 = vadd.f32 %v1924_v25, %v1812_v4  ;;  %2879 = vmatprep.mubr.bf16.mxu1 %v5186_v53  ;;  %2992 = vmatprep.mubr.bf16.mxu0 %v5186_v53  ;;  %v1818_v4 = vadd.f32 %v5101_v6, %v5605_v30  ;;  %v1970_v40 = vmax.f32 %v1923_v59, 0.0  ;;  %v2096_v6 = vld [vmem:[#allocation7 + $0x318] sm:$0xff]  ;;  %v1822_v35 = vadd.f32 %v5153_v63, %v1709_v55 }
 0x1e6   :  { %v1926_v52 = vpop.f32.mrf.mxu0  ;;  %2880 = vmatmul.mubr.bf16.gmra.mxu1 %v5173_v50  ;;  %2993 = vmatmul.mubr.bf16.gmra.mxu0 %v5173_v50  ;;  %5606 = vst [vmem:[#allocation18_spill] sm:$0xff] %v5220_v2  ;;  %v2100_v25 = vld [vmem:[#allocation7 + $0x338] sm:$0xff]  ;;  %v1824_v63 = vadd.f32 %v5179_v26, %v1711_v29  ;;  %v4042_v26 = vcombine.low %v5222_v60, %v5227_v62 }
 0x1e7   :  { %v1971_v57 = vmax.f32 %v1925_v10, 0.0  ;;  %v1927_v39 = vadd.f32 %v1926_v52, %v1814_v41  ;;  %3050 = vmatpush2.bf16.msra.mxu1 %v4066_v5  ;;  %3163 = vmatpush2.bf16.msra.mxu0 %v5183_v21  ;;  %v1829_v10 = vpop.f32.mrf.mxu1  ;;  %v5233_v52 = vcombine.low %v2104_v49, %v2108_v56  ;;  %v5244_v1 = vcombine.high %v2096_v6, %v2100_v25  ;;  %v2088_v55 = vld [vmem:[#allocation7 + $0x2d8] sm:$0xff] }
 0x1e8   :  { %v1930_v34 = vpop.f32.mrf.mxu0  ;;  %3051 = vmatprep.subr.bf16.mxu1 %v4059_v47  ;;  %3164 = vmatprep.subr.bf16.mxu0 %v5194_v13  ;;  %v5609_v47 = vld [vmem:[#allocation40_spill] sm:$0xff]  ;;  %v5257_v29 = vcombine.low %v2096_v6, %v2100_v25  ;;  %v5618_v6 = vld [vmem:[#allocation45_spill] sm:$0xff] }
 0x1e9   :  { %v5225_v5 = vpack.c.bf16 %v1971_v57, %v1969_v33  ;;  %v1972_v9 = vmax.f32 %v1927_v39, 0.0  ;;  %v1820_v41 = vadd.f32 %v5127_v32, %v5609_v47  ;;  %5610 = vst [vmem:[#allocation31_spill] sm:$0xff] %v5233_v52  ;;  %v1931_v33 = vadd.f32 %v1930_v34, %v1818_v4  ;;  %v5611_v57 = vld [vmem:[#allocation27_spill] sm:$0xff]  ;;  %v5612_v39 = vld [vmem:[#allocation28_spill] sm:$0xff]  ;;  %5613 = vst [vmem:[#allocation34_spill] sm:$0xff] %v5244_v1 }
 0x1ea   :  { %v1932_v17 = vpop.f32.mrf.mxu0  ;;  %v1606_v30 = vadd.f32 %v5612_v39, %v5611_v57  ;;  %v4043_v32 = vcombine.high %v5222_v60, %v5227_v62  ;;  %v2092_v4 = vld [vmem:[#allocation7 + $0x2f8] sm:$0xff]  ;;  %v2079_v62 = vld [vmem:[#allocation7 + $0x290] sm:$0xff] }
 0x1eb   :  { %5608 = vst [vmem:[#allocation33_spill] sm:$0xff] %v5225_v5  ;;  %v5236_v59 = vpack.c.bf16 %v1972_v9, %v1970_v40  ;;  %3052 = vmatpush2.bf16.msra.mxu1 %v4058_v51  ;;  %3165 = vmatpush2.bf16.msra.mxu0 %v5211_v19  ;;  %v1933_v49 = vadd.f32 %v1932_v17, %v1820_v41  ;;  %v2091_v51 = vld [vmem:[#allocation7 + $0x2f0] sm:$0xff]  ;;  %v5614_v34 = vld [vmem:[#allocation29_spill] sm:$0xff]  ;;  %v1831_v9 = vpop.f32.mrf.mxu1 }
 0x1ec   :  { %v1934_v22 = vpop.f32.mrf.mxu0  ;;  %3053 = vmatprep.subr.bf16.mxu1 %v4051_v23  ;;  %3166 = vmatprep.subr.bf16.mxu0 %v5220_v2  ;;  %v5615_v23 = vld [vmem:[#allocation30_spill] sm:$0xff]  ;;  %v5616_v41 = vld [vmem:[#allocation44_spill] sm:$0xff]  ;;  %v5265_v60 = vcombine.high %v2088_v55, %v2092_v4 }
 0x1ed   :  { %v1935_v56 = vadd.f32 %v1934_v22, %v1822_v35  ;;  %2889 = vmatprep.mubr.bf16.mxu1 %v5236_v59  ;;  %3002 = vmatprep.mubr.bf16.mxu0 %v5236_v59  ;;  %v1608_v40 = vadd.f32 %v5615_v23, %v5614_v34  ;;  %v1719_v17 = vadd.f32 %v5616_v41, %v1606_v30  ;;  %v1973_v35 = vmax.f32 %v1931_v33, 0.0  ;;  %v5617_v22 = vld [vmem:[#allocation42_spill] sm:$0xff]  ;;  %v5619_v41 = vld [vmem:[#allocation43_spill] sm:$0xff] }
 0x1ee   :  { %v1936_v47 = vpop.f32.mrf.mxu0  ;;  %2890 = vmatmul.mubr.bf16.gmra.mxu1 %v5225_v5  ;;  %3003 = vmatmul.mubr.bf16.gmra.mxu0 %v5225_v5  ;;  %v1828_v34 = vadd.f32 %v5205_v48, %v5617_v22  ;;  %v4035_v5 = vcombine.high %v5246_v0, %v2091_v51  ;;  %v1974_v33 = vmax.f32 %v1933_v49, 0.0  ;;  %v1830_v48 = vadd.f32 %v1829_v10, %v5619_v41  ;;  %v1833_v22 = vpop.f32.mrf.mxu1  ;;  %v2071_v10 = vld [vmem:[#allocation7 + $0x250] sm:$0xff] }
 0x1ef   :  { %v1975_v57 = vmax.f32 %v1935_v56, 0.0  ;;  %v1937_v39 = vadd.f32 %v1936_v47, %v1824_v63  ;;  %3054 = vmatpush2.bf16.msra.mxu1 %v4050_v15  ;;  %3167 = vmatpush2.bf16.msra.mxu0 %v5233_v52  ;;  %v1721_v25 = vadd.f32 %v5618_v6, %v1608_v40  ;;  %v2083_v63 = vld [vmem:[#allocation7 + $0x2b0] sm:$0xff]  ;;  %v2080_v56 = vld [vmem:[#allocation7 + $0x298] sm:$0xff]  ;;  %v5272_v52 = vcombine.low %v2088_v55, %v2092_v4 }
 0x1f0   :  { %v1940_v23 = vpop.f32.mrf.mxu0  ;;  %3055 = vmatprep.subr.bf16.mxu1 %v4043_v32  ;;  %3168 = vmatprep.subr.bf16.mxu0 %v5244_v1  ;;  %v2084_v47 = vld [vmem:[#allocation7 + $0x2b8] sm:$0xff]  ;;  %v4034_v1 = vcombine.low %v5246_v0, %v2091_v51  ;;  %v1832_v2 = vadd.f32 %v1831_v9, %v1719_v17  ;;  %v4027_v40 = vcombine.high %v2079_v62, %v2083_v63  ;;  %v2075_v51 = vld [vmem:[#allocation7 + $0x270] sm:$0xff] }
 0x1f1   :  { %v5268_v30 = vpack.c.bf16 %v1975_v57, %v1973_v35  ;;  %v1976_v15 = vmax.f32 %v1937_v39, 0.0  ;;  %v1941_v13 = vadd.f32 %v1940_v23, %v1828_v34  ;;  %v5278_v35 = vcombine.high %v2080_v56, %v2084_v47  ;;  %v2072_v55 = vld [vmem:[#allocation7 + $0x258] sm:$0xff]  ;;  %v2063_v41 = vld [vmem:[#allocation7 + $0x210] sm:$0xff] }
 0x1f2   :  { %v1942_v32 = vpop.f32.mrf.mxu0  ;;  %v1834_v57 = vadd.f32 %v1833_v22, %v1721_v25  ;;  %v2076_v4 = vld [vmem:[#allocation7 + $0x278] sm:$0xff]  ;;  %v4019_v23 = vcombine.high %v2071_v10, %v2075_v51 }
 0x1f3   :  { %v5274_v19 = vpack.c.bf16 %v1976_v15, %v1974_v33  ;;  %3056 = vmatpush2.bf16.msra.mxu1 %v4042_v26  ;;  %3169 = vmatpush2.bf16.msra.mxu0 %v5257_v29  ;;  %v1943_v39 = vadd.f32 %v1942_v32, %v1830_v48  ;;  %v1977_v26 = vmax.f32 %v1941_v13, 0.0  ;;  %v5288_v6 = vcombine.high %v2072_v55, %v2076_v4  ;;  %v2064_v13 = vld [vmem:[#allocation7 + $0x218] sm:$0xff] }
 0x1f4   :  { %v1944_v49 = vpop.f32.mrf.mxu0  ;;  %3057 = vmatprep.subr.bf16.mxu1 %v4035_v5  ;;  %3170 = vmatprep.subr.bf16.mxu0 %v5265_v60  ;;  %v4026_v5 = vcombine.low %v2079_v62, %v2083_v63  ;;  %v2067_v62 = vld [vmem:[#allocation7 + $0x230] sm:$0xff]  ;;  %v2068_v63 = vld [vmem:[#allocation7 + $0x238] sm:$0xff] }
 0x1f5   :  { %v1945_v0 = vadd.f32 %v1944_v49, %v1832_v2  ;;  %2899 = vmatprep.mubr.bf16.mxu1 %v5274_v19  ;;  %3012 = vmatprep.mubr.bf16.mxu0 %v5274_v19  ;;  %v5285_v2 = vcombine.low %v2080_v56, %v2084_v47  ;;  %v1978_v25 = vmax.f32 %v1943_v39, 0.0  ;;  %v5295_v56 = vcombine.low %v2072_v55, %v2076_v4 }
 0x1f6   :  { %v1946_v9 = vpop.f32.mrf.mxu0  ;;  %2900 = vmatmul.mubr.bf16.gmra.mxu1 %v5268_v30  ;;  %3013 = vmatmul.mubr.bf16.gmra.mxu0 %v5268_v30  ;;  %v4011_v47 = vcombine.high %v2063_v41, %v2067_v62  ;;  %v5300_v22 = vcombine.high %v2064_v13, %v2068_v63  ;;  %v4010_v32 = vcombine.low %v2063_v41, %v2067_v62 }
 0x1f7   :  { %v1979_v17 = vmax.f32 %v1945_v0, 0.0  ;;  %v1947_v34 = vadd.f32 %v1946_v9, %v1834_v57  ;;  %3058 = vmatpush2.bf16.msra.mxu1 %v4034_v1  ;;  %3171 = vmatpush2.bf16.msra.mxu0 %v5272_v52  ;;  %v4018_v1 = vcombine.low %v2071_v10, %v2075_v51  ;;  %v4012_v49 = vcombine.low %v2064_v13, %v2068_v63 }
 0x1f8   :  { %3059 = vmatprep.subr.bf16.mxu1 %v4027_v40  ;;  %3172 = vmatprep.subr.bf16.mxu0 %v5278_v35  ;;  %v5620_v40 = vld [vmem:[#allocation15_spill] sm:$0xff] }
 0x1f9   :  { %v5290_v33 = vpack.c.bf16 %v1979_v17, %v1977_v26  ;;  %v1980_v15 = vmax.f32 %v1947_v34, 0.0 }
 0x1fb   :  { %v5292_v48 = vpack.c.bf16 %v1980_v15, %v1978_v25  ;;  %3060 = vmatpush2.bf16.msra.mxu1 %v4026_v5  ;;  %3173 = vmatpush2.bf16.msra.mxu0 %v5285_v2 }
 0x1fc   :  { %3061 = vmatprep.subr.bf16.mxu1 %v4019_v23  ;;  %3174 = vmatprep.subr.bf16.mxu0 %v5288_v6 }
 0x1fd   :  { %2909 = vmatprep.mubr.bf16.mxu1 %v5292_v48  ;;  %3022 = vmatprep.mubr.bf16.mxu0 %v5292_v48 }
 0x1fe   :  { %2910 = vmatmul.mubr.bf16.gmra.mxu1 %v5290_v33  ;;  %3023 = vmatmul.mubr.bf16.gmra.mxu0 %v5290_v33 }
 0x1ff   :  { %3062 = vmatpush2.bf16.msra.mxu1 %v4018_v1  ;;  %3065 = vmatprep.mubr.bf16.mxu1 %v4981_v24 }
 0x200   :  { %3175 = vmatpush2.bf16.msra.mxu0 %v5295_v56  ;;  %3178 = vmatprep.mubr.bf16.mxu0 %v4981_v24  ;;  %v5623_v24 = vld [vmem:[#allocation18_spill] sm:$0xff] }
 0x201   :  { %3063 = vmatprep.subr.bf16.mxu1 %v4011_v47  ;;  %3176 = vmatprep.subr.bf16.mxu0 %v5300_v22 }
 0x203   :  { %3064 = vmatpush2.bf16.msra.mxu1 %v4010_v32 }
 0x204   :  { %3177 = vmatpush2.bf16.msra.mxu0 %v4012_v49  ;;  %4198 = vmatprep.subr.bf16.mxu1 %v5620_v40 }
 0x206   :  { %3066 = vmatmul.mubr.bf16.vlgmr.msra.gmra.mxu1 %v4974_v28 }
 0x207   :  { %3179 = vmatmul.mubr.bf16.vlgmr.msra.gmra.mxu0 %v4974_v28  ;;  %3075 = vmatprep.mubr.bf16.mxu1 %v5030_v14  ;;  %v5622_v28 = vld [vmem:[#allocation17_spill] sm:$0xff] }
 0x208   :  { %4214 = vmatpush1.bf16.msra.mxu1 %v4758_v16  ;;  %3188 = vmatprep.mubr.bf16.mxu0 %v5030_v14  ;;  %v5621_v16 = vld [vmem:[#allocation16_spill] sm:$0xff] }
 0x209   :  { %4199 = vmatprep.subr.bf16.mxu1 %v4985_v27  ;;  %v5624_v27 = vld [vmem:[#allocation33_spill] sm:$0xff] }
 0x20c   :  { %4215 = vmatpush1.bf16.msra.mxu1 %v5000_v38  ;;  %v5625_v38 = vld [vmem:[#allocation31_spill] sm:$0xff] }
 0x20d   :  { %4200 = vmatprep.subr.bf16.mxu1 %v5012_v11  ;;  %v5626_v11 = vld [vmem:[#allocation34_spill] sm:$0xff] }
 0x20e   :  { %3076 = vmatmul.mubr.bf16.gmra.mxu1 %v5017_v43 }
 0x20f   :  { %3189 = vmatmul.mubr.bf16.gmra.mxu0 %v5017_v43  ;;  %3085 = vmatprep.mubr.bf16.mxu1 %v5082_v36  ;;  %v2127_v43 = vlaneseq }
 0x210   :  { %4216 = vmatpush1.bf16.msra.mxu1 %v5027_v3  ;;  %3198 = vmatprep.mubr.bf16.mxu0 %v5082_v36 }
 0x211   :  { %4201 = vmatprep.subr.bf16.mxu1 %v5038_v44  ;;  %v5369_v3 = vshrl.u32 %v2127_v43, 7 }
 0x213   :  { %v2129_v14 = vsub.s32 0, %v5369_v3  ;;  %v2137_v44 = vsub.s32 2, %v5369_v3 }
 0x214   :  { %4217 = vmatpush1.bf16.msra.mxu1 %v5055_v12  ;;  %v2133_v12 = vsub.s32 1, %v5369_v3 }
 0x215   :  { %4202 = vmatprep.subr.bf16.mxu1 %v5064_v46  ;;  %v2141_v46 = vsub.s32 3, %v5369_v3 }
 0x216   :  { %3086 = vmatmul.mubr.bf16.gmra.mxu1 %v5069_v45 }
 0x217   :  { %3199 = vmatmul.mubr.bf16.gmra.mxu0 %v5069_v45  ;;  %3095 = vmatprep.mubr.bf16.mxu1 %v5134_v31  ;;  %v5375_v45 = vld [vmem:[#allocation8] sm:$0xff] }
 0x218   :  { %4218 = vmatpush1.bf16.msra.mxu1 %v5079_v58  ;;  %3208 = vmatprep.mubr.bf16.mxu0 %v5134_v31  ;;  %v5378_v58 = vrot.slane %v5375_v45, %v2129_v14  ;;  %v5381_v36 = vrot.slane %v5375_v45, %v2137_v44 }
 0x219   :  { %4203 = vmatprep.subr.bf16.mxu1 %v5090_v20  ;;  %v5384_v20 = vrot.slane %v5375_v45, %v2133_v12 }
 0x21c   :  { %4219 = vmatpush1.bf16.msra.mxu1 %v5107_v8  ;;  %v5387_v8 = vrot.slane %v5375_v45, %v2141_v46 }
 0x21d   :  { %4204 = vmatprep.subr.bf16.mxu1 %v5116_v61 }
 0x21e   :  { %3096 = vmatmul.mubr.bf16.gmra.mxu1 %v5121_v54 }
 0x21f   :  { %3209 = vmatmul.mubr.bf16.gmra.mxu0 %v5121_v54  ;;  %3105 = vmatprep.mubr.bf16.mxu1 %v5186_v53 }
 0x220   :  { %4220 = vmatpush1.bf16.msra.mxu1 %v5131_v37 }
 0x221   :  { %4205 = vmatprep.subr.bf16.mxu1 %v5142_v18 }
 0x224   :  { %4221 = vmatpush1.bf16.msra.mxu1 %v5159_v7 }
 0x225   :  { %4206 = vmatprep.subr.bf16.mxu1 %v5168_v42 }
 0x226   :  { %3106 = vmatmul.mubr.bf16.gmra.mxu1 %v5173_v50 }
 0x227   :  { %3115 = vmatprep.mubr.bf16.mxu1 %v5236_v59 }
 0x228   :  { %4222 = vmatpush2.bf16.msra.mxu1 %v5183_v21 }
 0x229   :  { %4207 = vmatprep.subr.bf16.mxu1 %v5621_v16 }
 0x22c   :  { %4223 = vmatpush2.bf16.msra.mxu1 %v5622_v28 }
 0x22d   :  { %4208 = vmatprep.subr.bf16.mxu1 %v5623_v24 }
 0x22e   :  { %3116 = vmatmul.mubr.bf16.gmra.mxu1 %v5624_v27 }
 0x22f   :  { %3125 = vmatprep.mubr.bf16.mxu1 %v5274_v19 }
 0x230   :  { %4224 = vmatpush2.bf16.msra.mxu1 %v5625_v38 }
 0x231   :  { %4209 = vmatprep.subr.bf16.mxu1 %v5626_v11 }
 0x234   :  { %4225 = vmatpush2.bf16.msra.mxu1 %v5257_v29 }
 0x235   :  { %4210 = vmatprep.subr.bf16.mxu1 %v5265_v60 }
 0x236   :  { %3126 = vmatmul.mubr.bf16.gmra.mxu1 %v5268_v30 }
 0x237   :  { %3135 = vmatprep.mubr.bf16.mxu1 %v5292_v48 }
 0x238   :  { %4226 = vmatpush2.bf16.msra.mxu1 %v5272_v52 }
 0x239   :  { %4211 = vmatprep.subr.bf16.mxu1 %v5278_v35 }
 0x23c   :  { %4227 = vmatpush2.bf16.msra.mxu1 %v5285_v2 }
 0x23d   :  { %4212 = vmatprep.subr.bf16.mxu1 %v5288_v6 }
 0x23e   :  { %3136 = vmatmul.mubr.bf16.gmra.mxu1 %v5290_v33 }
 0x23f   :  { %3218 = vmatprep.mubr.bf16.mxu1 %v5186_v53 }
 0x240   :  { %4228 = vmatpush2.bf16.msra.mxu1 %v5295_v56 }
 0x241   :  { %4213 = vmatprep.subr.bf16.mxu1 %v5300_v22 }
 0x244   :  { %4229 = vmatpush2.bf16.msra.mxu1 %v4012_v49 }
 0x247   :  { %3219 = vmatmul.mubr.bf16.vlgmr.msra.gmra.mxu1 %v5173_v50 }
 0x248   :  { %3228 = vmatprep.mubr.bf16.mxu1 %v5236_v59 }
 0x24f   :  { %3229 = vmatmul.mubr.bf16.gmra.mxu1 %v5624_v27 }
 0x250   :  { %3238 = vmatprep.mubr.bf16.mxu1 %v5274_v19 }
 0x257   :  { %3239 = vmatmul.mubr.bf16.gmra.mxu1 %v5268_v30 }
 0x258   :  { %3248 = vmatprep.mubr.bf16.mxu1 %v5292_v48 }
 0x25f   :  { %3249 = vmatmul.mubr.bf16.gmra.mxu1 %v5290_v33 }
 0x286   :  { %v2841_v61 = vpop.f32.mrf.mxu1  ;;  %v2954_v54 = vpop.f32.mrf.mxu0 }
 0x287   :  { %v2842_v18 = vadd.f32 %v2841_v61, %v5378_v58  ;;  %v2955_v7 = vadd.f32 %v2954_v54, %v5381_v36 }
 0x288   :  { %v2843_v37 = vpop.f32.mrf.mxu1  ;;  %v2956_v31 = vpop.f32.mrf.mxu0 }
 0x289   :  { %v2844_v42 = vadd.f32 %v2843_v37, %v5384_v20  ;;  %v2957_v50 = vadd.f32 %v2956_v31, %v5387_v8 }
 0x28a   :  { %v2845_v21 = vpop.f32.mrf.mxu1  ;;  %v2958_v53 = vpop.f32.mrf.mxu0 }
 0x28b   :  { %v4134_v19 = vpack.c.bf16 %v2844_v42, %v2842_v18  ;;  %v4135_v52 = vpack.c.bf16 %v2957_v50, %v2955_v7  ;;  %v2846_v60 = vadd.f32 %v2845_v21, %v5378_v58  ;;  %v2959_v30 = vadd.f32 %v2958_v53, %v5381_v36 }
 0x28c   :  { %v2847_v59 = vpop.f32.mrf.mxu1  ;;  %v2960_v29 = vpop.f32.mrf.mxu0 }
 0x28d   :  { %3643 = vst [vmem:[#allocation10] sm:$0xff] %v4134_v19  ;;  %3644 = vst [vmem:[#allocation10 + $0x8] sm:$0xff] %v4135_v52  ;;  %v2848_v35 = vadd.f32 %v2847_v59, %v5384_v20  ;;  %v2961_v10 = vadd.f32 %v2960_v29, %v5387_v8 }
 0x28e   :  { %v2851_v57 = vpop.f32.mrf.mxu1  ;;  %v2964_v39 = vpop.f32.mrf.mxu0 }
 0x28f   :  { %v4138_v0 = vpack.c.bf16 %v2848_v35, %v2846_v60  ;;  %v4139_v51 = vpack.c.bf16 %v2961_v10, %v2959_v30  ;;  %v2852_v9 = vadd.f32 %v2851_v57, %v5378_v58  ;;  %v2965_v5 = vadd.f32 %v2964_v39, %v5381_v36 }
 0x290   :  { %v2853_v55 = vpop.f32.mrf.mxu1  ;;  %v2966_v4 = vpop.f32.mrf.mxu0 }
 0x291   :  { %3647 = vst [vmem:[#allocation10 + $0x20] sm:$0xff] %v4138_v0  ;;  %3648 = vst [vmem:[#allocation10 + $0x28] sm:$0xff] %v4139_v51  ;;  %v2854_v26 = vadd.f32 %v2853_v55, %v5384_v20  ;;  %v2967_v17 = vadd.f32 %v2966_v4, %v5387_v8 }
 0x292   :  { %v2855_v34 = vpop.f32.mrf.mxu1  ;;  %v2968_v2 = vpop.f32.mrf.mxu0 }
 0x293   :  { %v4142_v23 = vpack.c.bf16 %v2854_v26, %v2852_v9  ;;  %v4143_v6 = vpack.c.bf16 %v2967_v17, %v2965_v5  ;;  %v2856_v15 = vadd.f32 %v2855_v34, %v5378_v58  ;;  %v2969_v41 = vadd.f32 %v2968_v2, %v5381_v36 }
 0x294   :  { %v2857_v25 = vpop.f32.mrf.mxu1  ;;  %v2970_v33 = vpop.f32.mrf.mxu0 }
 0x295   :  { %3651 = vst [vmem:[#allocation10 + $0x40] sm:$0xff] %v4142_v23  ;;  %3652 = vst [vmem:[#allocation10 + $0x48] sm:$0xff] %v4143_v6  ;;  %v2858_v62 = vadd.f32 %v2857_v25, %v5384_v20  ;;  %v2971_v13 = vadd.f32 %v2970_v33, %v5387_v8 }
 0x296   :  { %v2861_v63 = vpop.f32.mrf.mxu1  ;;  %v2974_v48 = vpop.f32.mrf.mxu0 }
 0x297   :  { %v4146_v1 = vpack.c.bf16 %v2858_v62, %v2856_v15  ;;  %v4147_v56 = vpack.c.bf16 %v2971_v13, %v2969_v41  ;;  %v2862_v32 = vadd.f32 %v2861_v63, %v5378_v58  ;;  %v2975_v49 = vadd.f32 %v2974_v48, %v5381_v36 }
 0x298   :  { %v2863_v47 = vpop.f32.mrf.mxu1  ;;  %v2976_v22 = vpop.f32.mrf.mxu0 }
 0x299   :  { %3655 = vst [vmem:[#allocation10 + $0x60] sm:$0xff] %v4146_v1  ;;  %3656 = vst [vmem:[#allocation10 + $0x68] sm:$0xff] %v4147_v56  ;;  %v2864_v40 = vadd.f32 %v2863_v47, %v5384_v20  ;;  %v2977_v16 = vadd.f32 %v2976_v22, %v5387_v8 }
 0x29a   :  { %v2865_v28 = vpop.f32.mrf.mxu1  ;;  %v2978_v24 = vpop.f32.mrf.mxu0 }
 0x29b   :  { %v4150_v27 = vpack.c.bf16 %v2864_v40, %v2862_v32  ;;  %v4151_v38 = vpack.c.bf16 %v2977_v16, %v2975_v49  ;;  %v2866_v14 = vadd.f32 %v2865_v28, %v5378_v58  ;;  %v2979_v44 = vadd.f32 %v2978_v24, %v5381_v36 }
 0x29c   :  { %v2867_v11 = vpop.f32.mrf.mxu1  ;;  %v2980_v43 = vpop.f32.mrf.mxu0 }
 0x29d   :  { %3659 = vst [vmem:[#allocation10 + $0x80] sm:$0xff] %v4150_v27  ;;  %3660 = vst [vmem:[#allocation10 + $0x88] sm:$0xff] %v4151_v38  ;;  %v2868_v12 = vadd.f32 %v2867_v11, %v5384_v20  ;;  %v2981_v46 = vadd.f32 %v2980_v43, %v5387_v8 }
 0x29e   :  { %v2871_v61 = vpop.f32.mrf.mxu1  ;;  %v2984_v54 = vpop.f32.mrf.mxu0 }
 0x29f   :  { %v4154_v37 = vpack.c.bf16 %v2868_v12, %v2866_v14  ;;  %v4155_v31 = vpack.c.bf16 %v2981_v46, %v2979_v44  ;;  %v2872_v42 = vadd.f32 %v2871_v61, %v5378_v58  ;;  %v2985_v50 = vadd.f32 %v2984_v54, %v5381_v36 }
 0x2a0   :  { %v2873_v18 = vpop.f32.mrf.mxu1  ;;  %v2986_v7 = vpop.f32.mrf.mxu0 }
 0x2a1   :  { %3663 = vst [vmem:[#allocation10 + $0xa0] sm:$0xff] %v4154_v37  ;;  %3664 = vst [vmem:[#allocation10 + $0xa8] sm:$0xff] %v4155_v31  ;;  %v2874_v21 = vadd.f32 %v2873_v18, %v5384_v20  ;;  %v2987_v53 = vadd.f32 %v2986_v7, %v5387_v8 }
 0x2a2   :  { %v2875_v19 = vpop.f32.mrf.mxu1  ;;  %v2988_v52 = vpop.f32.mrf.mxu0 }
 0x2a3   :  { %v4158_v59 = vpack.c.bf16 %v2874_v21, %v2872_v42  ;;  %v4159_v29 = vpack.c.bf16 %v2987_v53, %v2985_v50  ;;  %v2876_v35 = vadd.f32 %v2875_v19, %v5378_v58  ;;  %v2989_v10 = vadd.f32 %v2988_v52, %v5381_v36 }
 0x2a4   :  { %v2877_v60 = vpop.f32.mrf.mxu1  ;;  %v2990_v30 = vpop.f32.mrf.mxu0 }
 0x2a5   :  { %3667 = vst [vmem:[#allocation10 + $0xc0] sm:$0xff] %v4158_v59  ;;  %3668 = vst [vmem:[#allocation10 + $0xc8] sm:$0xff] %v4159_v29  ;;  %v2878_v57 = vadd.f32 %v2877_v60, %v5384_v20  ;;  %v2991_v39 = vadd.f32 %v2990_v30, %v5387_v8 }
 0x2a6   :  { %v2881_v0 = vpop.f32.mrf.mxu1  ;;  %v2994_v51 = vpop.f32.mrf.mxu0 }
 0x2a7   :  { %v4162_v55 = vpack.c.bf16 %v2878_v57, %v2876_v35  ;;  %v4163_v4 = vpack.c.bf16 %v2991_v39, %v2989_v10  ;;  %v2882_v26 = vadd.f32 %v2881_v0, %v5378_v58  ;;  %v2995_v17 = vadd.f32 %v2994_v51, %v5381_v36 }
 0x2a8   :  { %v2883_v9 = vpop.f32.mrf.mxu1  ;;  %v2996_v5 = vpop.f32.mrf.mxu0 }
 0x2a9   :  { %3671 = vst [vmem:[#allocation10 + $0xe0] sm:$0xff] %v4162_v55  ;;  %3672 = vst [vmem:[#allocation10 + $0xe8] sm:$0xff] %v4163_v4  ;;  %v2884_v34 = vadd.f32 %v2883_v9, %v5384_v20  ;;  %v2997_v2 = vadd.f32 %v2996_v5, %v5387_v8 }
 0x2aa   :  { %v2885_v23 = vpop.f32.mrf.mxu1  ;;  %v2998_v6 = vpop.f32.mrf.mxu0 }
 0x2ab   :  { %v4166_v25 = vpack.c.bf16 %v2884_v34, %v2882_v26  ;;  %v4167_v33 = vpack.c.bf16 %v2997_v2, %v2995_v17  ;;  %v2886_v62 = vadd.f32 %v2885_v23, %v5378_v58  ;;  %v2999_v13 = vadd.f32 %v2998_v6, %v5381_v36 }
 0x2ac   :  { %v2887_v15 = vpop.f32.mrf.mxu1  ;;  %v3000_v41 = vpop.f32.mrf.mxu0  ;;  %v2145_v34 = vsub.s32 4, %v5369_v3  ;;  %v2149_v2 = vsub.s32 5, %v5369_v3 }
 0x2ad   :  { %3675 = vst [vmem:[#allocation10 + $0x100] sm:$0xff] %v4166_v25  ;;  %3676 = vst [vmem:[#allocation10 + $0x108] sm:$0xff] %v4167_v33  ;;  %v2888_v63 = vadd.f32 %v2887_v15, %v5384_v20  ;;  %v3001_v48 = vadd.f32 %v3000_v41, %v5387_v8 }
 0x2ae   :  { %v2891_v1 = vpop.f32.mrf.mxu1  ;;  %v3004_v56 = vpop.f32.mrf.mxu0 }
 0x2af   :  { %v4170_v47 = vpack.c.bf16 %v2888_v63, %v2886_v62  ;;  %v4171_v22 = vpack.c.bf16 %v3001_v48, %v2999_v13  ;;  %v2892_v40 = vadd.f32 %v2891_v1, %v5378_v58  ;;  %v3005_v16 = vadd.f32 %v3004_v56, %v5381_v36 }
 0x2b0   :  { %v2893_v32 = vpop.f32.mrf.mxu1  ;;  %v3006_v49 = vpop.f32.mrf.mxu0  ;;  %v2153_v62 = vsub.s32 6, %v5369_v3  ;;  %v2157_v13 = vsub.s32 7, %v5369_v3 }
 0x2b1   :  { %3679 = vst [vmem:[#allocation10 + $0x120] sm:$0xff] %v4170_v47  ;;  %3680 = vst [vmem:[#allocation10 + $0x128] sm:$0xff] %v4171_v22  ;;  %v2894_v28 = vadd.f32 %v2893_v32, %v5384_v20  ;;  %v3007_v24 = vadd.f32 %v3006_v49, %v5387_v8  ;;  %v5454_v47 = vrot.slane %v5375_v45, %v2145_v34 }
 0x2b2   :  { %v2895_v27 = vpop.f32.mrf.mxu1  ;;  %v3008_v38 = vpop.f32.mrf.mxu0  ;;  %v5457_v22 = vrot.slane %v5375_v45, %v2149_v2 }
 0x2b3   :  { %v4174_v11 = vpack.c.bf16 %v2894_v28, %v2892_v40  ;;  %v4175_v43 = vpack.c.bf16 %v3007_v24, %v3005_v16  ;;  %v2896_v12 = vadd.f32 %v2895_v27, %v5378_v58  ;;  %v3009_v46 = vadd.f32 %v3008_v38, %v5381_v36 }
 0x2b4   :  { %v2897_v14 = vpop.f32.mrf.mxu1  ;;  %v3010_v44 = vpop.f32.mrf.mxu0  ;;  %v5464_v28 = vrot.slane %v5375_v45, %v2153_v62  ;;  %v5467_v24 = vrot.slane %v5375_v45, %v2157_v13 }
 0x2b5   :  { %3683 = vst [vmem:[#allocation10 + $0x140] sm:$0xff] %v4174_v11  ;;  %3684 = vst [vmem:[#allocation10 + $0x148] sm:$0xff] %v4175_v43  ;;  %v2898_v61 = vadd.f32 %v2897_v14, %v5384_v20  ;;  %v3011_v54 = vadd.f32 %v3010_v44, %v5387_v8 }
 0x2b6   :  { %v2901_v37 = vpop.f32.mrf.mxu1  ;;  %v3014_v31 = vpop.f32.mrf.mxu0 }
 0x2b7   :  { %v4178_v18 = vpack.c.bf16 %v2898_v61, %v2896_v12  ;;  %v4179_v7 = vpack.c.bf16 %v3011_v54, %v3009_v46  ;;  %v2902_v21 = vadd.f32 %v2901_v37, %v5378_v58  ;;  %v3015_v53 = vadd.f32 %v3014_v31, %v5381_v36 }
 0x2b8   :  { %v2903_v42 = vpop.f32.mrf.mxu1  ;;  %v3016_v50 = vpop.f32.mrf.mxu0 }
 0x2b9   :  { %3687 = vst [vmem:[#allocation10 + $0x160] sm:$0xff] %v4178_v18  ;;  %3688 = vst [vmem:[#allocation10 + $0x168] sm:$0xff] %v4179_v7  ;;  %v2904_v19 = vadd.f32 %v2903_v42, %v5384_v20  ;;  %v3017_v52 = vadd.f32 %v3016_v50, %v5387_v8 }
 0x2ba   :  { %v2905_v59 = vpop.f32.mrf.mxu1  ;;  %v3018_v29 = vpop.f32.mrf.mxu0 }
 0x2bb   :  { %v4182_v60 = vpack.c.bf16 %v2904_v19, %v2902_v21  ;;  %v4183_v30 = vpack.c.bf16 %v3017_v52, %v3015_v53  ;;  %v2906_v57 = vadd.f32 %v2905_v59, %v5378_v58  ;;  %v3019_v39 = vadd.f32 %v3018_v29, %v5381_v36 }
 0x2bc   :  { %v2907_v35 = vpop.f32.mrf.mxu1  ;;  %v3020_v10 = vpop.f32.mrf.mxu0 }
 0x2bd   :  { %3691 = vst [vmem:[#allocation10 + $0x180] sm:$0xff] %v4182_v60  ;;  %3692 = vst [vmem:[#allocation10 + $0x188] sm:$0xff] %v4183_v30  ;;  %v2908_v0 = vadd.f32 %v2907_v35, %v5384_v20  ;;  %v3021_v51 = vadd.f32 %v3020_v10, %v5387_v8 }
 0x2be   :  { %v2911_v55 = vpop.f32.mrf.mxu1  ;;  %v3024_v4 = vpop.f32.mrf.mxu0 }
 0x2bf   :  { %v4186_v9 = vpack.c.bf16 %v2908_v0, %v2906_v57  ;;  %v4187_v5 = vpack.c.bf16 %v3021_v51, %v3019_v39  ;;  %v2912_v23 = vadd.f32 %v2911_v55, %v5378_v58  ;;  %v3025_v6 = vadd.f32 %v3024_v4, %v5381_v36 }
 0x2c0   :  { %v2913_v26 = vpop.f32.mrf.mxu1  ;;  %v3026_v17 = vpop.f32.mrf.mxu0 }
 0x2c1   :  { %3695 = vst [vmem:[#allocation10 + $0x1a0] sm:$0xff] %v4186_v9  ;;  %3696 = vst [vmem:[#allocation10 + $0x1a8] sm:$0xff] %v4187_v5  ;;  %v2914_v25 = vadd.f32 %v2913_v26, %v5384_v20  ;;  %v3027_v33 = vadd.f32 %v3026_v17, %v5387_v8 }
 0x2c2   :  { %v2915_v15 = vpop.f32.mrf.mxu1  ;;  %v3028_v41 = vpop.f32.mrf.mxu0 }
 0x2c3   :  { %v4190_v63 = vpack.c.bf16 %v2914_v25, %v2912_v23  ;;  %v4191_v48 = vpack.c.bf16 %v3027_v33, %v3025_v6  ;;  %v2916_v32 = vadd.f32 %v2915_v15, %v5378_v58  ;;  %v3029_v49 = vadd.f32 %v3028_v41, %v5381_v36 }
 0x2c4   :  { %v2917_v1 = vpop.f32.mrf.mxu1  ;;  %v3030_v56 = vpop.f32.mrf.mxu0 }
 0x2c5   :  { %3699 = vst [vmem:[#allocation10 + $0x1c0] sm:$0xff] %v4190_v63  ;;  %3700 = vst [vmem:[#allocation10 + $0x1c8] sm:$0xff] %v4191_v48  ;;  %v2918_v40 = vadd.f32 %v2917_v1, %v5384_v20  ;;  %v3031_v3 = vadd.f32 %v3030_v56, %v5387_v8 }
 0x2c6   :  { %v3067_v16 = vpop.f32.mrf.mxu1 }
 0x2c7   :  { %v4194_v27 = vpack.c.bf16 %v2918_v40, %v2916_v32  ;;  %v4195_v38 = vpack.c.bf16 %v3031_v3, %v3029_v49  ;;  %v3180_v11 = vpop.f32.mrf.mxu0  ;;  %v3068_v58 = vadd.f32 %v3067_v16, %v5454_v47 }
 0x2c8   :  { %v3069_v43 = vpop.f32.mrf.mxu1  ;;  %v3181_v8 = vadd.f32 %v3180_v11, %v5464_v28 }
 0x2c9   :  { %3703 = vst [vmem:[#allocation10 + $0x1e0] sm:$0xff] %v4194_v27  ;;  %3704 = vst [vmem:[#allocation10 + $0x1e8] sm:$0xff] %v4195_v38  ;;  %v3070_v36 = vadd.f32 %v3069_v43, %v5457_v22  ;;  %v3182_v20 = vpop.f32.mrf.mxu0 }
 0x2ca   :  { %v3183_v14 = vadd.f32 %v3182_v20, %v5467_v24  ;;  %v3071_v44 = vpop.f32.mrf.mxu1 }
 0x2cb   :  { %v4136_v12 = vpack.c.bf16 %v3070_v36, %v3068_v58  ;;  %v3184_v46 = vpop.f32.mrf.mxu0  ;;  %v3072_v54 = vadd.f32 %v3071_v44, %v5454_v47 }
 0x2cc   :  { %v4137_v45 = vpack.c.bf16 %v3183_v14, %v3181_v8  ;;  %v3073_v61 = vpop.f32.mrf.mxu1  ;;  %v3185_v18 = vadd.f32 %v3184_v46, %v5464_v28 }
 0x2cd   :  { %3645 = vst [vmem:[#allocation10 + $0x10] sm:$0xff] %v4136_v12  ;;  %v3074_v37 = vadd.f32 %v3073_v61, %v5457_v22  ;;  %v3186_v31 = vpop.f32.mrf.mxu0 }
 0x2ce   :  { %3646 = vst [vmem:[#allocation10 + $0x18] sm:$0xff] %v4137_v45  ;;  %v3187_v7 = vadd.f32 %v3186_v31, %v5467_v24  ;;  %v3077_v42 = vpop.f32.mrf.mxu1 }
 0x2cf   :  { %v4140_v50 = vpack.c.bf16 %v3074_v37, %v3072_v54  ;;  %v3190_v21 = vpop.f32.mrf.mxu0  ;;  %v3078_v52 = vadd.f32 %v3077_v42, %v5454_v47 }
 0x2d0   :  { %v4141_v53 = vpack.c.bf16 %v3187_v7, %v3185_v18  ;;  %v3079_v19 = vpop.f32.mrf.mxu1  ;;  %v3191_v60 = vadd.f32 %v3190_v21, %v5464_v28 }
 0x2d1   :  { %3649 = vst [vmem:[#allocation10 + $0x30] sm:$0xff] %v4140_v50  ;;  %v3080_v59 = vadd.f32 %v3079_v19, %v5457_v22  ;;  %v3192_v29 = vpop.f32.mrf.mxu0 }
 0x2d2   :  { %3650 = vst [vmem:[#allocation10 + $0x38] sm:$0xff] %v4141_v53  ;;  %v3193_v30 = vadd.f32 %v3192_v29, %v5467_v24  ;;  %v3081_v35 = vpop.f32.mrf.mxu1 }
 0x2d3   :  { %v4144_v10 = vpack.c.bf16 %v3080_v59, %v3078_v52  ;;  %v3194_v57 = vpop.f32.mrf.mxu0  ;;  %v3082_v51 = vadd.f32 %v3081_v35, %v5454_v47 }
 0x2d4   :  { %v4145_v39 = vpack.c.bf16 %v3193_v30, %v3191_v60  ;;  %v3083_v0 = vpop.f32.mrf.mxu1  ;;  %v3195_v9 = vadd.f32 %v3194_v57, %v5464_v28 }
 0x2d5   :  { %3653 = vst [vmem:[#allocation10 + $0x50] sm:$0xff] %v4144_v10  ;;  %v3084_v55 = vadd.f32 %v3083_v0, %v5457_v22  ;;  %v3196_v4 = vpop.f32.mrf.mxu0 }
 0x2d6   :  { %3654 = vst [vmem:[#allocation10 + $0x58] sm:$0xff] %v4145_v39  ;;  %v3197_v5 = vadd.f32 %v3196_v4, %v5467_v24  ;;  %v3087_v26 = vpop.f32.mrf.mxu1 }
 0x2d7   :  { %v4148_v17 = vpack.c.bf16 %v3084_v55, %v3082_v51  ;;  %v3200_v34 = vpop.f32.mrf.mxu0  ;;  %v3088_v6 = vadd.f32 %v3087_v26, %v5454_v47 }
 0x2d8   :  { %v4149_v2 = vpack.c.bf16 %v3197_v5, %v3195_v9  ;;  %v3089_v23 = vpop.f32.mrf.mxu1  ;;  %v3201_v15 = vadd.f32 %v3200_v34, %v5464_v28 }
 0x2d9   :  { %3657 = vst [vmem:[#allocation10 + $0x70] sm:$0xff] %v4148_v17  ;;  %v3090_v25 = vadd.f32 %v3089_v23, %v5457_v22  ;;  %v3202_v33 = vpop.f32.mrf.mxu0 }
 0x2da   :  { %3658 = vst [vmem:[#allocation10 + $0x78] sm:$0xff] %v4149_v2  ;;  %v3203_v41 = vadd.f32 %v3202_v33, %v5467_v24  ;;  %v3091_v62 = vpop.f32.mrf.mxu1 }
 0x2db   :  { %v4152_v13 = vpack.c.bf16 %v3090_v25, %v3088_v6  ;;  %v3204_v63 = vpop.f32.mrf.mxu0  ;;  %v3092_v56 = vadd.f32 %v3091_v62, %v5454_v47 }
 0x2dc   :  { %v4153_v48 = vpack.c.bf16 %v3203_v41, %v3201_v15  ;;  %v3093_v1 = vpop.f32.mrf.mxu1  ;;  %v3205_v40 = vadd.f32 %v3204_v63, %v5464_v28 }
 0x2dd   :  { %3661 = vst [vmem:[#allocation10 + $0x90] sm:$0xff] %v4152_v13  ;;  %v3094_v32 = vadd.f32 %v3093_v1, %v5457_v22  ;;  %v3206_v49 = vpop.f32.mrf.mxu0 }
 0x2de   :  { %3662 = vst [vmem:[#allocation10 + $0x98] sm:$0xff] %v4153_v48  ;;  %v3207_v3 = vadd.f32 %v3206_v49, %v5467_v24  ;;  %v3097_v16 = vpop.f32.mrf.mxu1 }
 0x2df   :  { %v4156_v27 = vpack.c.bf16 %v3094_v32, %v3092_v56  ;;  %v3210_v38 = vpop.f32.mrf.mxu0  ;;  %v3098_v58 = vadd.f32 %v3097_v16, %v5454_v47 }
 0x2e0   :  { %v4157_v11 = vpack.c.bf16 %v3207_v3, %v3205_v40  ;;  %v3099_v43 = vpop.f32.mrf.mxu1  ;;  %v3211_v8 = vadd.f32 %v3210_v38, %v5464_v28 }
 0x2e1   :  { %3665 = vst [vmem:[#allocation10 + $0xb0] sm:$0xff] %v4156_v27  ;;  %v3100_v36 = vadd.f32 %v3099_v43, %v5457_v22  ;;  %v3212_v20 = vpop.f32.mrf.mxu0 }
 0x2e2   :  { %3666 = vst [vmem:[#allocation10 + $0xb8] sm:$0xff] %v4157_v11  ;;  %v3213_v14 = vadd.f32 %v3212_v20, %v5467_v24  ;;  %v3101_v44 = vpop.f32.mrf.mxu1 }
 0x2e3   :  { %v4160_v12 = vpack.c.bf16 %v3100_v36, %v3098_v58  ;;  %v3214_v46 = vpop.f32.mrf.mxu0  ;;  %v3102_v54 = vadd.f32 %v3101_v44, %v5454_v47 }
 0x2e4   :  { %v4161_v45 = vpack.c.bf16 %v3213_v14, %v3211_v8  ;;  %v3103_v61 = vpop.f32.mrf.mxu1  ;;  %v3215_v18 = vadd.f32 %v3214_v46, %v5464_v28 }
 0x2e5   :  { %3669 = vst [vmem:[#allocation10 + $0xd0] sm:$0xff] %v4160_v12  ;;  %v3104_v37 = vadd.f32 %v3103_v61, %v5457_v22  ;;  %v3216_v31 = vpop.f32.mrf.mxu0 }
 0x2e6   :  { %3670 = vst [vmem:[#allocation10 + $0xd8] sm:$0xff] %v4161_v45  ;;  %v3217_v7 = vadd.f32 %v3216_v31, %v5467_v24  ;;  %v3107_v42 = vpop.f32.mrf.mxu1 }
 0x2e7   :  { %v4164_v50 = vpack.c.bf16 %v3104_v37, %v3102_v54  ;;  %v3108_v19 = vadd.f32 %v3107_v42, %v5454_v47 }
 0x2e8   :  { %v4165_v21 = vpack.c.bf16 %v3217_v7, %v3215_v18  ;;  %v3109_v53 = vpop.f32.mrf.mxu1 }
 0x2e9   :  { %3673 = vst [vmem:[#allocation10 + $0xf0] sm:$0xff] %v4164_v50  ;;  %v3110_v52 = vadd.f32 %v3109_v53, %v5457_v22 }
 0x2ea   :  { %3674 = vst [vmem:[#allocation10 + $0xf8] sm:$0xff] %v4165_v21  ;;  %v3111_v59 = vpop.f32.mrf.mxu1 }
 0x2eb   :  { %v4168_v29 = vpack.c.bf16 %v3110_v52, %v3108_v19  ;;  %v3112_v30 = vadd.f32 %v3111_v59, %v5454_v47 }
 0x2ec   :  { %v3113_v60 = vpop.f32.mrf.mxu1 }
 0x2ed   :  { %3677 = vst [vmem:[#allocation10 + $0x110] sm:$0xff] %v4168_v29  ;;  %v3114_v35 = vadd.f32 %v3113_v60, %v5457_v22 }
 0x2ee   :  { %v3117_v10 = vpop.f32.mrf.mxu1 }
 0x2ef   :  { %v4172_v57 = vpack.c.bf16 %v3114_v35, %v3112_v30  ;;  %v3118_v0 = vadd.f32 %v3117_v10, %v5454_v47 }
 0x2f0   :  { %v3119_v39 = vpop.f32.mrf.mxu1 }
 0x2f1   :  { %3681 = vst [vmem:[#allocation10 + $0x130] sm:$0xff] %v4172_v57  ;;  %v3120_v51 = vadd.f32 %v3119_v39, %v5457_v22 }
 0x2f2   :  { %v3121_v55 = vpop.f32.mrf.mxu1 }
 0x2f3   :  { %v4176_v4 = vpack.c.bf16 %v3120_v51, %v3118_v0  ;;  %v3122_v5 = vadd.f32 %v3121_v55, %v5454_v47 }
 0x2f4   :  { %v3123_v9 = vpop.f32.mrf.mxu1 }
 0x2f5   :  { %3685 = vst [vmem:[#allocation10 + $0x150] sm:$0xff] %v4176_v4  ;;  %v3124_v26 = vadd.f32 %v3123_v9, %v5457_v22 }
 0x2f6   :  { %v3127_v17 = vpop.f32.mrf.mxu1 }
 0x2f7   :  { %v4180_v34 = vpack.c.bf16 %v3124_v26, %v3122_v5  ;;  %v3128_v23 = vadd.f32 %v3127_v17, %v5454_v47 }
 0x2f8   :  { %v3129_v2 = vpop.f32.mrf.mxu1 }
 0x2f9   :  { %3689 = vst [vmem:[#allocation10 + $0x170] sm:$0xff] %v4180_v34  ;;  %v3130_v6 = vadd.f32 %v3129_v2, %v5457_v22 }
 0x2fa   :  { %v3131_v25 = vpop.f32.mrf.mxu1 }
 0x2fb   :  { %v4184_v33 = vpack.c.bf16 %v3130_v6, %v3128_v23  ;;  %v3132_v41 = vadd.f32 %v3131_v25, %v5454_v47 }
 0x2fc   :  { %v3133_v15 = vpop.f32.mrf.mxu1 }
 0x2fd   :  { %3693 = vst [vmem:[#allocation10 + $0x190] sm:$0xff] %v4184_v33  ;;  %v3134_v62 = vadd.f32 %v3133_v15, %v5457_v22 }
 0x2fe   :  { %v3137_v13 = vpop.f32.mrf.mxu1 }
 0x2ff   :  { %v4188_v63 = vpack.c.bf16 %v3134_v62, %v3132_v41  ;;  %v3138_v1 = vadd.f32 %v3137_v13, %v5454_v47 }
 0x300   :  { %v3139_v48 = vpop.f32.mrf.mxu1 }
 0x301   :  { %3697 = vst [vmem:[#allocation10 + $0x1b0] sm:$0xff] %v4188_v63  ;;  %v3140_v56 = vadd.f32 %v3139_v48, %v5457_v22 }
 0x302   :  { %v3141_v32 = vpop.f32.mrf.mxu1 }
 0x303   :  { %v4192_v49 = vpack.c.bf16 %v3140_v56, %v3138_v1  ;;  %v3142_v3 = vadd.f32 %v3141_v32, %v5454_v47 }
 0x304   :  { %v3143_v40 = vpop.f32.mrf.mxu1 }
 0x305   :  { %3701 = vst [vmem:[#allocation10 + $0x1d0] sm:$0xff] %v4192_v49  ;;  %v3144_v16 = vadd.f32 %v3143_v40, %v5457_v22 }
 0x307   :  { %v4196_v27 = vpack.c.bf16 %v3144_v16, %v3142_v3  ;;  %v3220_v38 = vpop.f32.mrf.mxu1 }
 0x308   :  { %v3221_v43 = vadd.f32 %v3220_v38, %v5464_v28 }
 0x309   :  { %3705 = vst [vmem:[#allocation10 + $0x1f0] sm:$0xff] %v4196_v27  ;;  %v3222_v11 = vpop.f32.mrf.mxu1 }
 0x30a   :  { %v3223_v58 = vadd.f32 %v3222_v11, %v5467_v24 }
 0x30b   :  { %v3224_v36 = vpop.f32.mrf.mxu1 }
 0x30c   :  { %v4169_v20 = vpack.c.bf16 %v3223_v58, %v3221_v43  ;;  %v3225_v14 = vadd.f32 %v3224_v36, %v5464_v28 }
 0x30d   :  { %v3226_v8 = vpop.f32.mrf.mxu1 }
 0x30e   :  { %3678 = vst [vmem:[#allocation10 + $0x118] sm:$0xff] %v4169_v20  ;;  %v3227_v44 = vadd.f32 %v3226_v8, %v5467_v24 }
 0x30f   :  { %v3230_v12 = vpop.f32.mrf.mxu1 }
 0x310   :  { %v4173_v47 = vpack.c.bf16 %v3227_v44, %v3225_v14  ;;  %v3231_v22 = vadd.f32 %v3230_v12, %v5464_v28 }
 0x311   :  { %v3232_v46 = vpop.f32.mrf.mxu1 }
 0x312   :  { %3682 = vst [vmem:[#allocation10 + $0x138] sm:$0xff] %v4173_v47  ;;  %v3233_v45 = vadd.f32 %v3232_v46, %v5467_v24 }
 0x313   :  { %v3234_v61 = vpop.f32.mrf.mxu1 }
 0x314   :  { %v4177_v54 = vpack.c.bf16 %v3233_v45, %v3231_v22  ;;  %v3235_v31 = vadd.f32 %v3234_v61, %v5464_v28 }
 0x315   :  { %v3236_v37 = vpop.f32.mrf.mxu1 }
 0x316   :  { %3686 = vst [vmem:[#allocation10 + $0x158] sm:$0xff] %v4177_v54  ;;  %v3237_v18 = vadd.f32 %v3236_v37, %v5467_v24 }
 0x317   :  { %v3240_v7 = vpop.f32.mrf.mxu1 }
 0x318   :  { %v4181_v42 = vpack.c.bf16 %v3237_v18, %v3235_v31  ;;  %v3241_v21 = vadd.f32 %v3240_v7, %v5464_v28 }
 0x319   :  { %v3242_v50 = vpop.f32.mrf.mxu1 }
 0x31a   :  { %3690 = vst [vmem:[#allocation10 + $0x178] sm:$0xff] %v4181_v42  ;;  %v3243_v53 = vadd.f32 %v3242_v50, %v5467_v24 }
 0x31b   :  { %v3244_v19 = vpop.f32.mrf.mxu1 }
 0x31c   :  { %v4185_v52 = vpack.c.bf16 %v3243_v53, %v3241_v21  ;;  %v3245_v29 = vadd.f32 %v3244_v19, %v5464_v28 }
 0x31d   :  { %v3246_v59 = vpop.f32.mrf.mxu1 }
 0x31e   :  { %3694 = vst [vmem:[#allocation10 + $0x198] sm:$0xff] %v4185_v52  ;;  %v3247_v60 = vadd.f32 %v3246_v59, %v5467_v24 }
 0x31f   :  { %v3250_v30 = vpop.f32.mrf.mxu1 }
 0x320   :  { %v4189_v35 = vpack.c.bf16 %v3247_v60, %v3245_v29  ;;  %v3251_v57 = vadd.f32 %v3250_v30, %v5464_v28 }
 0x321   :  { %v3252_v10 = vpop.f32.mrf.mxu1 }
 0x322   :  { %3698 = vst [vmem:[#allocation10 + $0x1b8] sm:$0xff] %v4189_v35  ;;  %v3253_v39 = vadd.f32 %v3252_v10, %v5467_v24 }
 0x323   :  { %v3254_v0 = vpop.f32.mrf.mxu1 }
 0x324   :  { %v4193_v51 = vpack.c.bf16 %v3253_v39, %v3251_v57  ;;  %v3255_v4 = vadd.f32 %v3254_v0, %v5464_v28 }
 0x325   :  { %v3256_v55 = vpop.f32.mrf.mxu1 }
 0x326   :  { %3702 = vst [vmem:[#allocation10 + $0x1d8] sm:$0xff] %v4193_v51  ;;  %v3257_v9 = vadd.f32 %v3256_v55, %v5467_v24 }
 0x328   :  { %v4197_v5 = vpack.c.bf16 %v3257_v9, %v3255_v4 }
 0x32a   :  { %3706 = vst [vmem:[#allocation10 + $0x1f8] sm:$0xff] %v4197_v5 }
 0x32b   :  { %4653 = shalt.err (!%p4650_p10)
}
 0x32c   :  { %3718 = dma.vmem_to_hbm [thread:$0]  %s3713_s3, 8192, %s5543_s4, [#allocation4], %s4677_s5, %s4677_s5, %s4678_s6  }
 0x32d   :  { %4668 = dma.done.wait [#allocation4], 8192  }
 0x32e   :  { %4669 = vsyncadd [#allocation4], 4294959104 }
 0x32f   :  { %3722 = vsyncpa [#allocation3], 1 }
 0x330   :  { %3723 = vsyncpa [#allocation6], 1 }
 0x331   :  { %3724 = vsyncpa [#allocation9], 1 }
 0x332   :  { %3725 = vsyncpa [#allocation4], 1 }

</bundles_post_ra>
